<compile_context>
chip_gen: v6e
topology: v6e:2x2x1
jax: 0.10.0
libtpu: 0.0.40
codegen_flags: <defaults>
</compile_context>

<pallas_src>
import functools

import jax
import jax.numpy as jnp
from jax.experimental import pallas as pl
from jax.experimental.pallas import tpu as pltpu

_LANES = 128      # lane width of a vreg / MXU N tile
_ROW_PACK = 16    # sublane packing for bf16-adjacent tiles (safe for f32 too)
_TM_LARGE = 256   # batch tile for large batches: matches v6e/v7x 256-deep MXU


def _round_up(n, m):
    return ((n + m - 1) // m) * m


def _mlp_fused_kernel(*refs, num_layers):
    """Fused MLP forward for one batch tile.

    refs = (x_ref, w0_ref, b0_ref, w1_ref, b1_ref, ..., o_ref)
      x_ref : [tm, in_pad]          (VMEM, f32)
      wl_ref: [inl_pad, outl_pad]   (VMEM, bf16, pre-transposed vs torch [out,in])
      bl_ref: [1, outl_pad]         (VMEM, f32)
      o_ref : [tm, out_pad]         (VMEM, f32)
    ReLU after every hidden layer, plain Linear at the output.
    """
    x_ref = refs[0]
    o_ref = refs[-1]
    layer_refs = refs[1:-1]

    h = x_ref[...].astype(jnp.float32)
    for l in range(num_layers):
        w_ref = layer_refs[2 * l]
        b_ref = layer_refs[2 * l + 1]
        # bf16 x bf16 -> f32 accumulate: native MXU path on v5e/v6e/v7x.
        y = jnp.dot(h.astype(w_ref.dtype), w_ref[...],
                    preferred_element_type=jnp.float32)
        y = y + b_ref[...]                      # f32 bias add (VPU)
        if l < num_layers - 1:
            y = jnp.maximum(y, 0.0)             # ReLU on hidden layers only
        h = y
    o_ref[...] = h.astype(o_ref.dtype)


def _vmem_budget_bytes(params, tm, in_pad, out_pad, x_itemsize, out_itemsize,
                       weight_buffers):
    """Explicit VMEM budget: resident weights + pipelined tiles + scratch."""
    w_bytes = 0
    max_pad = in_pad
    for w_p, b_p in params:
        w_bytes += w_p.size * w_p.dtype.itemsize + b_p.size * b_p.dtype.itemsize
        max_pad = max(max_pad, w_p.shape[1])
    act_bytes = 2 * tm * (in_pad * x_itemsize + out_pad * out_itemsize)  # dbl-buffered
    scratch = 2 * tm * max_pad * 4        # f32 intermediates that may spill to VMEM
    need = weight_buffers * w_bytes + act_bytes + scratch
    # 2x safety margin, floor 8 MiB, cap at v7x's 64 MiB physical VMEM per TC.
    return int(min(max(2 * need, 8 << 20), 64 << 20))


def network_reduced_forward(x, params, output_size):
    """Forward pass matching NetworkReduced.forward.

    x:      [batch, input_size] (f32)
    params: list of (W_pad [in_pad, out_pad] bf16, b_pad [1, out_pad] f32),
            feature dims already zero-padded to multiples of 128.
    Returns [batch, output_size] in x.dtype.
    """
    batch, in_features = x.shape
    num_layers = len(params)
    in_pad = params[0][0].shape[0]
    out_pad = params[-1][0].shape[1]

    # ---- batch tiling --------------------------------------------------
    # Small batches: one grid step (kernel is step-latency bound at these
    # sizes).  Large batches: 256-row tiles -> MXU M=256 on v6e/v7x and
    # several steps per TensorCore for useful megacore sharding on v7x.
    batch_pad = _round_up(max(batch, _ROW_PACK), _ROW_PACK)
    if batch_pad <= _TM_LARGE:
        tm = batch_pad
    else:
        tm = _TM_LARGE
        batch_pad = _round_up(batch_pad, tm)
    grid = (batch_pad // tm,)

    # Pad the input only when actually required (skips an extra HBM round
    # trip of x when batch/in_features are already aligned).
    # TODO(synk): for very large ragged batches, handle the tail tile with an
    # in-kernel mask instead of a padded copy.
    if batch_pad != batch or in_pad != in_features:
        x_p = jnp.zeros((batch_pad, in_pad), x.dtype)
        x_p = x_p.at[:batch, :in_features].set(x)
    else:
        x_p = x

    flat_args = []
    for w_p, b_p in params:
        flat_args.append(w_p)
        flat_args.append(b_p)

    kernel = functools.partial(_mlp_fused_kernel, num_layers=num_layers)
    out_shape = jax.ShapeDtypeStruct((batch_pad, out_pad), x.dtype)

    def build_call(single_buffer_weights):
        # Weights/biases map to block (0, 0) every step -> VMEM-resident.
        # Single-buffer them: double-buffering a constant block is pure waste.
        if single_buffer_weights:
            def resident(shape):
                return pl.BlockSpec(shape, lambda i: (0, 0),
                                    pipeline_mode=pl.Buffered(1))
        else:
            def resident(shape):
                return pl.BlockSpec(shape, lambda i: (0, 0))

        in_specs = [pl.BlockSpec((tm, in_pad), lambda i: (i, 0))]
        for w_p, b_p in params:
            in_specs.append(resident(w_p.shape))
            in_specs.append(resident(b_p.shape))

        vmem_limit = _vmem_budget_bytes(
            params, tm, in_pad, out_pad,
            x.dtype.itemsize, out_shape.dtype.itemsize,
            weight_buffers=1 if single_buffer_weights else 2)

        return pl.pallas_call(
            kernel,
            out_shape=out_shape,
            grid_spec=pltpu.PrefetchScalarGridSpec(
                num_scalar_prefetch=0,
                grid=grid,
                in_specs=in_specs,
                out_specs=pl.BlockSpec((tm, out_pad), lambda i: (i, 0)),
            ),
            compiler_params=pltpu.CompilerParams(
                # Independent batch tiles -> shard across v7x's 2 TCs when
                # there are multiple steps; otherwise skip megacore entirely.
                dimension_semantics=("parallel",) if grid[0] > 1 else ("arbitrary",),
                vmem_limit_bytes=vmem_limit,
            ),
        )

    try:
        out_padded = build_call(True)(x_p, *flat_args)
    except Exception:
        # Fallback for JAX versions that reject pipeline_mode=Buffered(1)
        # on a resident-block spec.
        out_padded = build_call(False)(x_p, *flat_args)

    return out_padded[:batch, :output_size]


def init_params(key, input_size, output_size, hidden_layers,
                param_dtype=jnp.bfloat16):
    """Init mimicking nn.Linear's U(-1/sqrt(fan_in), 1/sqrt(fan_in)).

    Weights are stored pre-transposed as [in, out] in bf16 (MXU operand dtype)
    and zero-padded to 128-multiples on both dims; biases stay f32 (elementwise
    epilogue is f32 on all generations), padded to [1, out_pad].
    """
    sizes = [input_size] + list(hidden_layers) + [output_size]
    params = []
    for fan_in, fan_out in zip(sizes[:-1], sizes[1:]):
        key, kw, kb = jax.random.split(key, 3)
        bound = 1.0 / (fan_in ** 0.5)
        w_t = jax.random.uniform(kw, (fan_in, fan_out), jnp.float32, -bound, bound)
        b = jax.random.uniform(kb, (1, fan_out), jnp.float32, -bound, bound)

        in_pad = _round_up(fan_in, _LANES)
        out_pad = _round_up(fan_out, _LANES)
        w_p = jnp.zeros((in_pad, out_pad), param_dtype)
        w_p = w_p.at[:fan_in, :fan_out].set(w_t.astype(param_dtype))
        b_p = jnp.zeros((1, out_pad), jnp.float32).at[:, :fan_out].set(b)
        params.append((w_p, b_p))
    return params


def _reference_forward(x, params, input_size, output_size, hidden_layers):
    """Pure-JAX reference using the same bf16 weights / f32 accumulation."""
    sizes = [input_size] + list(hidden_layers) + [output_size]
    h = x.astype(jnp.float32)
    for l, (w_p, b_p) in enumerate(params):
        fan_in, fan_out = sizes[l], sizes[l + 1]
        w = w_p[:fan_in, :fan_out]
        b = b_p[:, :fan_out]
        y = jnp.dot(h.astype(w.dtype), w, preferred_element_type=jnp.float32) + b
        if l < len(params) - 1:
            y = jnp.maximum(y, 0.0)
        h = y
    return h


if __name__ == "__main__":
    key = jax.random.PRNGKey(0)
    key, kx = jax.random.split(key)

    # Small network; batch exercises the non-aligned padding path and the
    # single-grid-step (tm = padded batch) branch.
    batch = 200
    input_size = 32
    hidden_layers = [64, 32]
    output_size = 16

    x = jax.random.normal(kx, (batch, input_size), jnp.float32)
    params = init_params(key, input_size, output_size, hidden_layers)

    out = network_reduced_forward(x, params, output_size)
    jax.block_until_ready(out)

    assert out.shape == (batch, output_size), out.shape

    ref = _reference_forward(x, params, input_size, output_size, hidden_layers)
    max_err = float(jnp.max(jnp.abs(out - ref)))
    assert jnp.allclose(out, ref, rtol=1e-2, atol=1e-2), max_err

    print("KERNEL_OK")
</pallas_src>

<mosaic_0001>
module attributes {stable_mosaic.version = 11 : i64} {
  func.func @_mlp_fused_kernel(%arg0: i32, %arg1: memref<208x128xf32, #tpu.memory_space<vmem>>, %arg2: memref<128x128xbf16, #tpu.memory_space<vmem>>, %arg3: memref<1x128xf32, #tpu.memory_space<vmem>>, %arg4: memref<128x128xbf16, #tpu.memory_space<vmem>>, %arg5: memref<1x128xf32, #tpu.memory_space<vmem>>, %arg6: memref<128x128xbf16, #tpu.memory_space<vmem>>, %arg7: memref<1x128xf32, #tpu.memory_space<vmem>>, %arg8: memref<208x128xf32, #tpu.memory_space<vmem>>) attributes {dimension_semantics = [#tpu.dimension_semantics<arbitrary>], iteration_bounds = array<i64: 1>, scalar_prefetch = 0 : i64, scratch_operands = 0 : i64, tpu.core_type = #tpu.core_type<tc>, window_params = [{transform_indices = @transform_0, window_bounds = array<i64: 208, 128>}, {pipeline_mode = #tpu.pipeline_mode<synchronous>, transform_indices = @transform_1, window_bounds = array<i64: 128, 128>}, {pipeline_mode = #tpu.pipeline_mode<synchronous>, transform_indices = @transform_2, window_bounds = array<i64: 1, 128>}, {pipeline_mode = #tpu.pipeline_mode<synchronous>, transform_indices = @transform_3, window_bounds = array<i64: 128, 128>}, {pipeline_mode = #tpu.pipeline_mode<synchronous>, transform_indices = @transform_4, window_bounds = array<i64: 1, 128>}, {pipeline_mode = #tpu.pipeline_mode<synchronous>, transform_indices = @transform_5, window_bounds = array<i64: 128, 128>}, {pipeline_mode = #tpu.pipeline_mode<synchronous>, transform_indices = @transform_6, window_bounds = array<i64: 1, 128>}, {transform_indices = @transform_7, window_bounds = array<i64: 208, 128>}]} {
    %c0 = arith.constant 0 : index
    %c0_0 = arith.constant 0 : index
    %0 = vector.load %arg1[%c0, %c0_0] : memref<208x128xf32, #tpu.memory_space<vmem>>, vector<208x128xf32>
    %1 = arith.truncf %0 : vector<208x128xf32> to vector<208x128xbf16>
    %c0_1 = arith.constant 0 : index
    %c0_2 = arith.constant 0 : index
    %2 = vector.load %arg2[%c0_1, %c0_2] : memref<128x128xbf16, #tpu.memory_space<vmem>>, vector<128x128xbf16>
    %cst = arith.constant dense<0.000000e+00> : vector<208x128xf32>
    %3 = tpu.matmul %1, %2, %cst {dimension_numbers = #tpu.dot_dimension_numbers<[1], [0], [0], [1], [0, 0, 1, 1], [], []>} : vector<208x128xbf16>, vector<128x128xbf16>, vector<208x128xf32> -> vector<208x128xf32>
    %c0_3 = arith.constant 0 : index
    %c0_4 = arith.constant 0 : index
    %4 = vector.load %arg3[%c0_3, %c0_4] : memref<1x128xf32, #tpu.memory_space<vmem>>, vector<1x128xf32>
    %5 = vector.broadcast %4 : vector<1x128xf32> to vector<208x128xf32>
    %6 = arith.addf %3, %5 : vector<208x128xf32>
    %cst_5 = arith.constant 0.000000e+00 : f32
    %7 = vector.broadcast %cst_5 : f32 to vector<208x128xf32>
    %8 = arith.maximumf %6, %7 : vector<208x128xf32>
    %9 = arith.truncf %8 : vector<208x128xf32> to vector<208x128xbf16>
    %c0_6 = arith.constant 0 : index
    %c0_7 = arith.constant 0 : index
    %10 = vector.load %arg4[%c0_6, %c0_7] : memref<128x128xbf16, #tpu.memory_space<vmem>>, vector<128x128xbf16>
    %cst_8 = arith.constant dense<0.000000e+00> : vector<208x128xf32>
    %11 = tpu.matmul %9, %10, %cst_8 {dimension_numbers = #tpu.dot_dimension_numbers<[1], [0], [0], [1], [0, 0, 1, 1], [], []>} : vector<208x128xbf16>, vector<128x128xbf16>, vector<208x128xf32> -> vector<208x128xf32>
    %c0_9 = arith.constant 0 : index
    %c0_10 = arith.constant 0 : index
    %12 = vector.load %arg5[%c0_9, %c0_10] : memref<1x128xf32, #tpu.memory_space<vmem>>, vector<1x128xf32>
    %13 = vector.broadcast %12 : vector<1x128xf32> to vector<208x128xf32>
    %14 = arith.addf %11, %13 : vector<208x128xf32>
    %cst_11 = arith.constant 0.000000e+00 : f32
    %15 = vector.broadcast %cst_11 : f32 to vector<208x128xf32>
    %16 = arith.maximumf %14, %15 : vector<208x128xf32>
    %17 = arith.truncf %16 : vector<208x128xf32> to vector<208x128xbf16>
    %c0_12 = arith.constant 0 : index
    %c0_13 = arith.constant 0 : index
    %18 = vector.load %arg6[%c0_12, %c0_13] : memref<128x128xbf16, #tpu.memory_space<vmem>>, vector<128x128xbf16>
    %cst_14 = arith.constant dense<0.000000e+00> : vector<208x128xf32>
    %19 = tpu.matmul %17, %18, %cst_14 {dimension_numbers = #tpu.dot_dimension_numbers<[1], [0], [0], [1], [0, 0, 1, 1], [], []>} : vector<208x128xbf16>, vector<128x128xbf16>, vector<208x128xf32> -> vector<208x128xf32>
    %c0_15 = arith.constant 0 : index
    %c0_16 = arith.constant 0 : index
    %20 = vector.load %arg7[%c0_15, %c0_16] : memref<1x128xf32, #tpu.memory_space<vmem>>, vector<1x128xf32>
    %21 = vector.broadcast %20 : vector<1x128xf32> to vector<208x128xf32>
    %22 = arith.addf %19, %21 : vector<208x128xf32>
    %c0_17 = arith.constant 0 : index
    %c0_18 = arith.constant 0 : index
    %23 = vector.load %arg8[%c0_17, %c0_18] : memref<208x128xf32, #tpu.memory_space<vmem>>, vector<208x128xf32>
    tpu.vector_store %arg8[%c0_17, %c0_18], %22 {strides = array<i32>} : memref<208x128xf32, #tpu.memory_space<vmem>>, vector<208x128xf32>,
    return
  }
  func.func @transform_0(%arg0: i32) -> (i32, i32) {
    %c0_i32 = arith.constant 0 : i32
    %c0_i32_0 = arith.constant 0 : i32
    return %arg0, %c0_i32 : i32, i32
  }
  func.func @transform_1(%arg0: i32) -> (i32, i32) {
    %c0_i32 = arith.constant 0 : i32
    %c0_i32_0 = arith.constant 0 : i32
    %c0_i32_1 = arith.constant 0 : i32
    return %c0_i32, %c0_i32_0 : i32, i32
  }
  func.func @transform_2(%arg0: i32) -> (i32, i32) {
    %c0_i32 = arith.constant 0 : i32
    %c0_i32_0 = arith.constant 0 : i32
    %c0_i32_1 = arith.constant 0 : i32
    return %c0_i32, %c0_i32_0 : i32, i32
  }
  func.func @transform_3(%arg0: i32) -> (i32, i32) {
    %c0_i32 = arith.constant 0 : i32
    %c0_i32_0 = arith.constant 0 : i32
    %c0_i32_1 = arith.constant 0 : i32
    return %c0_i32, %c0_i32_0 : i32, i32
  }
  func.func @transform_4(%arg0: i32) -> (i32, i32) {
    %c0_i32 = arith.constant 0 : i32
    %c0_i32_0 = arith.constant 0 : i32
    %c0_i32_1 = arith.constant 0 : i32
    return %c0_i32, %c0_i32_0 : i32, i32
  }
  func.func @transform_5(%arg0: i32) -> (i32, i32) {
    %c0_i32 = arith.constant 0 : i32
    %c0_i32_0 = arith.constant 0 : i32
    %c0_i32_1 = arith.constant 0 : i32
    return %c0_i32, %c0_i32_0 : i32, i32
  }
  func.func @transform_6(%arg0: i32) -> (i32, i32) {
    %c0_i32 = arith.constant 0 : i32
    %c0_i32_0 = arith.constant 0 : i32
    %c0_i32_1 = arith.constant 0 : i32
    return %c0_i32, %c0_i32_0 : i32, i32
  }
  func.func @transform_7(%arg0: i32) -> (i32, i32) {
    %c0_i32 = arith.constant 0 : i32
    %c0_i32_0 = arith.constant 0 : i32
    return %arg0, %c0_i32 : i32, i32
  }
}

module attributes {stable_mosaic.version = 11 : i64} {
  func.func @_mlp_fused_kernel(%arg0: i32, %arg1: memref<208x128xf32, #tpu.memory_space<vmem>>, %arg2: memref<128x128xbf16, #tpu.memory_space<vmem>>, %arg3: memref<1x128xf32, #tpu.memory_space<vmem>>, %arg4: memref<128x128xbf16, #tpu.memory_space<vmem>>, %arg5: memref<1x128xf32, #tpu.memory_space<vmem>>, %arg6: memref<128x128xbf16, #tpu.memory_space<vmem>>, %arg7: memref<1x128xf32, #tpu.memory_space<vmem>>, %arg8: memref<208x128xf32, #tpu.memory_space<vmem>>) attributes {dimension_semantics = [#tpu.dimension_semantics<arbitrary>], iteration_bounds = array<i64: 1>, scalar_prefetch = 0 : i64, scratch_operands = 0 : i64, tpu.core_type = #tpu.core_type<tc>, window_params = [{transform_indices = @transform_0, window_bounds = array<i64: 208, 128>}, {pipeline_mode = #tpu.pipeline_mode<synchronous>, transform_indices = @transform_1, window_bounds = array<i64: 128, 128>}, {pipeline_mode = #tpu.pipeline_mode<synchronous>, transform_indices = @transform_2, window_bounds = array<i64: 1, 128>}, {pipeline_mode = #tpu.pipeline_mode<synchronous>, transform_indices = @transform_3, window_bounds = array<i64: 128, 128>}, {pipeline_mode = #tpu.pipeline_mode<synchronous>, transform_indices = @transform_4, window_bounds = array<i64: 1, 128>}, {pipeline_mode = #tpu.pipeline_mode<synchronous>, transform_indices = @transform_5, window_bounds = array<i64: 128, 128>}, {pipeline_mode = #tpu.pipeline_mode<synchronous>, transform_indices = @transform_6, window_bounds = array<i64: 1, 128>}, {transform_indices = @transform_7, window_bounds = array<i64: 208, 128>}]} {
    %c0 = arith.constant 0 : index
    %c0_0 = arith.constant 0 : index
    %0 = vector.load %arg1[%c0, %c0_0] : memref<208x128xf32, #tpu.memory_space<vmem>>, vector<208x128xf32>
    %1 = arith.truncf %0 : vector<208x128xf32> to vector<208x128xbf16>
    %c0_1 = arith.constant 0 : index
    %c0_2 = arith.constant 0 : index
    %2 = vector.load %arg2[%c0_1, %c0_2] : memref<128x128xbf16, #tpu.memory_space<vmem>>, vector<128x128xbf16>
    %cst = arith.constant dense<0.000000e+00> : vector<208x128xf32>
    %3 = tpu.matmul %1, %2, %cst {dimension_numbers = #tpu.dot_dimension_numbers<[1], [0], [0], [1], [0, 0, 1, 1], [], []>} : vector<208x128xbf16>, vector<128x128xbf16>, vector<208x128xf32> -> vector<208x128xf32>
    %c0_3 = arith.constant 0 : index
    %c0_4 = arith.constant 0 : index
    %4 = vector.load %arg3[%c0_3, %c0_4] : memref<1x128xf32, #tpu.memory_space<vmem>>, vector<1x128xf32>
    %5 = vector.broadcast %4 : vector<1x128xf32> to vector<208x128xf32>
    %6 = arith.addf %3, %5 : vector<208x128xf32>
    %cst_5 = arith.constant 0.000000e+00 : f32
    %7 = vector.broadcast %cst_5 : f32 to vector<208x128xf32>
    %8 = arith.maximumf %6, %7 : vector<208x128xf32>
    %9 = arith.truncf %8 : vector<208x128xf32> to vector<208x128xbf16>
    %c0_6 = arith.constant 0 : index
    %c0_7 = arith.constant 0 : index
    %10 = vector.load %arg4[%c0_6, %c0_7] : memref<128x128xbf16, #tpu.memory_space<vmem>>, vector<128x128xbf16>
    %cst_8 = arith.constant dense<0.000000e+00> : vector<208x128xf32>
    %11 = tpu.matmul %9, %10, %cst_8 {dimension_numbers = #tpu.dot_dimension_numbers<[1], [0], [0], [1], [0, 0, 1, 1], [], []>} : vector<208x128xbf16>, vector<128x128xbf16>, vector<208x128xf32> -> vector<208x128xf32>
    %c0_9 = arith.constant 0 : index
    %c0_10 = arith.constant 0 : index
    %12 = vector.load %arg5[%c0_9, %c0_10] : memref<1x128xf32, #tpu.memory_space<vmem>>, vector<1x128xf32>
    %13 = vector.broadcast %12 : vector<1x128xf32> to vector<208x128xf32>
    %14 = arith.addf %11, %13 : vector<208x128xf32>
    %cst_11 = arith.constant 0.000000e+00 : f32
    %15 = vector.broadcast %cst_11 : f32 to vector<208x128xf32>
    %16 = arith.maximumf %14, %15 : vector<208x128xf32>
    %17 = arith.truncf %16 : vector<208x128xf32> to vector<208x128xbf16>
    %c0_12 = arith.constant 0 : index
    %c0_13 = arith.constant 0 : index
    %18 = vector.load %arg6[%c0_12, %c0_13] : memref<128x128xbf16, #tpu.memory_space<vmem>>, vector<128x128xbf16>
    %cst_14 = arith.constant dense<0.000000e+00> : vector<208x128xf32>
    %19 = tpu.matmul %17, %18, %cst_14 {dimension_numbers = #tpu.dot_dimension_numbers<[1], [0], [0], [1], [0, 0, 1, 1], [], []>} : vector<208x128xbf16>, vector<128x128xbf16>, vector<208x128xf32> -> vector<208x128xf32>
    %c0_15 = arith.constant 0 : index
    %c0_16 = arith.constant 0 : index
    %20 = vector.load %arg7[%c0_15, %c0_16] : memref<1x128xf32, #tpu.memory_space<vmem>>, vector<1x128xf32>
    %21 = vector.broadcast %20 : vector<1x128xf32> to vector<208x128xf32>
    %22 = arith.addf %19, %21 : vector<208x128xf32>
    %c0_17 = arith.constant 0 : index
    %c0_18 = arith.constant 0 : index
    %23 = vector.load %arg8[%c0_17, %c0_18] : memref<208x128xf32, #tpu.memory_space<vmem>>, vector<208x128xf32>
    tpu.vector_store %arg8[%c0_17, %c0_18], %22 {strides = array<i32>} : memref<208x128xf32, #tpu.memory_space<vmem>>, vector<208x128xf32>,
    return
  }
  func.func @transform_0(%arg0: i32) -> (i32, i32) {
    %c0_i32 = arith.constant 0 : i32
    %c0_i32_0 = arith.constant 0 : i32
    return %arg0, %c0_i32 : i32, i32
  }
  func.func @transform_1(%arg0: i32) -> (i32, i32) {
    %c0_i32 = arith.constant 0 : i32
    %c0_i32_0 = arith.constant 0 : i32
    %c0_i32_1 = arith.constant 0 : i32
    return %c0_i32, %c0_i32_0 : i32, i32
  }
  func.func @transform_2(%arg0: i32) -> (i32, i32) {
    %c0_i32 = arith.constant 0 : i32
    %c0_i32_0 = arith.constant 0 : i32
    %c0_i32_1 = arith.constant 0 : i32
    return %c0_i32, %c0_i32_0 : i32, i32
  }
  func.func @transform_3(%arg0: i32) -> (i32, i32) {
    %c0_i32 = arith.constant 0 : i32
    %c0_i32_0 = arith.constant 0 : i32
    %c0_i32_1 = arith.constant 0 : i32
    return %c0_i32, %c0_i32_0 : i32, i32
  }
  func.func @transform_4(%arg0: i32) -> (i32, i32) {
    %c0_i32 = arith.constant 0 : i32
    %c0_i32_0 = arith.constant 0 : i32
    %c0_i32_1 = arith.constant 0 : i32
    return %c0_i32, %c0_i32_0 : i32, i32
  }
  func.func @transform_5(%arg0: i32) -> (i32, i32) {
    %c0_i32 = arith.constant 0 : i32
    %c0_i32_0 = arith.constant 0 : i32
    %c0_i32_1 = arith.constant 0 : i32
    return %c0_i32, %c0_i32_0 : i32, i32
  }
  func.func @transform_6(%arg0: i32) -> (i32, i32) {
    %c0_i32 = arith.constant 0 : i32
    %c0_i32_0 = arith.constant 0 : i32
    %c0_i32_1 = arith.constant 0 : i32
    return %c0_i32, %c0_i32_0 : i32, i32
  }
  func.func @transform_7(%arg0: i32) -> (i32, i32) {
    %c0_i32 = arith.constant 0 : i32
    %c0_i32_0 = arith.constant 0 : i32
    return %arg0, %c0_i32 : i32, i32
  }
}

</mosaic_0001>

<bundles_post_ra>
// kernel: tpu_custom_call.1
= control target key start
LH: loop header
LB: loop body
LE: loop exit
PB: predicated region body
PF: predicated region fallthrough
CT: control target
= control target key end

     0   :  { %12 = vsyncpa [#allocation3], 0  ;;  %s1639_s0 = inlined_call_operand.hbm [shape: f32[208,128], index: 0, kind: input, shape index: {}]   ;;  %s1640_s1 = inlined_call_operand.hbm [shape: bf16[128,128], index: 1, kind: input, shape index: {}]   ;;  %s1641_s2 = inlined_call_operand.vmem [shape: f32[1,128], index: 2, kind: input, shape index: {}]   ;;  %s1642_s3 = inlined_call_operand.hbm [shape: bf16[128,128], index: 3, kind: input, shape index: {}]   ;;  %s1643_s4 = inlined_call_operand.vmem [shape: f32[1,128], index: 4, kind: input, shape index: {}]   ;;  %s1644_s5 = inlined_call_operand.hbm [shape: bf16[128,128], index: 5, kind: input, shape index: {}]   ;;  %s1645_s6 = inlined_call_operand.vmem [shape: f32[1,128], index: 6, kind: input, shape index: {}]   ;;  %s1646_s7 = inlined_call_operand.hbm [shape: f32[208,128], index: 7, kind: output, shape index: {}]  }
   0x1   :  { %13 = vsyncpa [#allocation6], 0 }
   0x2   :  { %14 = vsyncpa [#allocation9], 0 }
   0x3   :  { %15 = vsyncpa [#allocation4], 0  ;;  %s1322_s24 = smov [#allocation5]  }
   0x4   :  { %s33_s25 = sshll.u32 %s1322_s24, 4  ;;  %s34_s25 = int_to_ptr.vmem [resolvable:$true] %s33_s25 }
   0x5   :  { %s1222_s26 = scalar_lea.vmem %s34_s25, 1024  ;;  %p1227_p1 = scmp.lt.s32.totalorder %s34_s25, %s34_s25 }
   0x6   :  { %p1223_p0 = scmp.ne.s32.totalorder %s34_s25, %s1222_s26  ;;  %p1228_p2 = scmp.lt.s32.totalorder %s1222_s26, %s1222_s26 }
   0x8   :  { %p1229_p3 = por %p1228_p2, %p1227_p1 }
   0xa   :  { %p1230_p4 = pnand %p1229_p3, %p1223_p0 }
   0xc   :  { %1233 = shalt.err (!%p1230_p4)
}
   0xd   :  { %s1323_s27 = smov 64   ;;  %s1324_s28 = smov 4  }
   0xe   :  { %39 = dma.hbm_to_vmem [thread:$0]  %s1640_s1, 1024, %s34_s25, [#allocation6], %s1323_s27, %s1323_s27, %s1324_s28  }
   0xf   :  { %s1325_s8 = smov [#allocation2]  }
  0x10   :  { %s21_s9 = sshll.u32 %s1325_s8, 4  ;;  %s22_s9 = int_to_ptr.vmem [resolvable:$true] %s21_s9 }
  0x11   :  { %s1242_s10 = scalar_lea.vmem %s22_s9, 3328  ;;  %p1247_p6 = scmp.lt.s32.totalorder %s22_s9, %s22_s9 }
  0x12   :  { %p1243_p5 = scmp.ne.s32.totalorder %s22_s9, %s1242_s10  ;;  %p1248_p7 = scmp.lt.s32.totalorder %s1242_s10, %s1242_s10 }
  0x14   :  { %p1249_p8 = por %p1248_p7, %p1247_p6 }
  0x16   :  { %p1250_p9 = pnand %p1249_p8, %p1243_p5 }
  0x18   :  { %1253 = shalt.err (!%p1250_p9)
}
  0x19   :  { %s1326_s11 = smov 128   ;;  %s1327_s12 = smov 8  }
  0x1a   :  { %27 = dma.hbm_to_vmem [thread:$0]  %s1639_s0, 3328, %s22_s9, [#allocation3], %s1326_s11, %s1326_s11, %s1327_s12  }
  0x1b   :  { %s1328_s1 = smov [#allocation7]   ;;  %s1329_s16 = smov [#allocation8]  }
  0x1c   :  { %s47_s15 = sshll.u32 %s1328_s1, 4  ;;  %s61_s17 = sshll.u32 %s1329_s16, 4  ;;  %s48_s15 = int_to_ptr.vmem [resolvable:$true] %s47_s15  ;;  %s62_s17 = int_to_ptr.vmem [resolvable:$true] %s61_s17 }
  0x1d   :  { %s1262_s18 = scalar_lea.vmem %s48_s15, 1024  ;;  %p1267_p11 = scmp.lt.s32.totalorder %s48_s15, %s48_s15 }
  0x1e   :  { %p1263_p10 = scmp.ne.s32.totalorder %s48_s15, %s1262_s18  ;;  %p1268_p12 = scmp.lt.s32.totalorder %s1262_s18, %s1262_s18 }
  0x20   :  { %p1269_p13 = por %p1268_p12, %p1267_p11 }
  0x22   :  { %p1270_p0 = pnand %p1269_p13, %p1263_p10 }
  0x24   :  { %1273 = shalt.err (!%p1270_p0)
}
  0x25   :  { %53 = dma.hbm_to_vmem [thread:$0]  %s1642_s3, 1024, %s48_s15, [#allocation6], %s1323_s27, %s1323_s27, %s1324_s28  }
  0x26   :  { %s1282_s0 = scalar_lea.vmem %s62_s17, 1024  ;;  %p1287_p2 = scmp.lt.s32.totalorder %s62_s17, %s62_s17 }
  0x27   :  { %p1283_p1 = scmp.ne.s32.totalorder %s62_s17, %s1282_s0  ;;  %p1288_p3 = scmp.lt.s32.totalorder %s1282_s0, %s1282_s0 }
  0x29   :  { %p1289_p4 = por %p1288_p3, %p1287_p2 }
  0x2b   :  { %p1290_p5 = pnand %p1289_p4, %p1283_p1 }
  0x2d   :  { %1293 = shalt.err (!%p1290_p5)
}
  0x2e   :  { %67 = dma.hbm_to_vmem [thread:$0]  %s1644_s5, 1024, %s62_s17, [#allocation9], %s1323_s27, %s1323_s27, %s1324_s28  }
  0x2f   :  { %1314 = dma.done.wait [#allocation3], 3328  }
  0x30   :  { %1315 = vsyncadd [#allocation3], 4294963968 }
  0x31   :  { %1316 = dma.done.wait [#allocation6], 2048  }
  0x32   :  { %1317 = vsyncadd [#allocation6], 4294965248 }
  0x33   :  { %1318 = dma.done.wait [#allocation9], 1024  }
  0x34   :  { %1319 = vsyncadd [#allocation9], 4294966272  ;;  %v1330_v0 = vmov 0.0   ;;  %vm1331_vm0 = vmmov 0   ;;  %v1190_v1 = vld [vmem:[#allocation5 + $0x38] sm:$0xff]   ;;  %v1191_v2 = vld [vmem:[#allocation5 + $0x30] sm:$0xff]  }
  0x35   :  { %959 = vmatprep.subr.bf16.mxu0 %v1330_v0  ;;  %975 = vmatprep.mubr.msk.bf16.mxu0 %vm1331_vm0, %v1330_v0  ;;  %v1192_v3 = vld [vmem:[#allocation5 + $0x28] sm:$0xff]   ;;  %v1193_v4 = vld [vmem:[#allocation5 + $0x20] sm:$0xff]   ;;  %v1194_v5 = vld [vmem:[#allocation5 + $0x18] sm:$0xff]  }
  0x36   :  { %1163 = vmatprep.subr.bf16.mxu1 %v1330_v0  ;;  %1003 = vmatprep.mubr.msk.bf16.mxu1 %vm1331_vm0, %v1330_v0  ;;  %v1195_v6 = vld [vmem:[#allocation5 + $0x10] sm:$0xff]   ;;  %v1196_v7 = vld [vmem:[#allocation5 + $0x8] sm:$0xff]   ;;  %v1197_v8 = vld [vmem:[#allocation5] sm:$0xff]  }
  0x37   :  { %960 = vmatpush3.bf16.msra.mxu0 %v1190_v1  ;;  %1171 = vmatpush3.bf16.msra.mxu1 %v1190_v1  ;;  %v83_v9 = vld [vmem:[#allocation2] sm:$0xff]  ;;  %v84_v10 = vld [vmem:[#allocation2 + $0x8] sm:$0xff]  ;;  %v97_v11 = vld [vmem:[#allocation2 + $0x70] sm:$0xff] }
  0x38   :  { %961 = vmatprep.subr.bf16.mxu0 %v1330_v0  ;;  %1164 = vmatprep.subr.bf16.mxu1 %v1330_v0  ;;  %v98_v12 = vld [vmem:[#allocation2 + $0x78] sm:$0xff]  ;;  %v109_v13 = vpack.c.bf16 %v84_v10, %v83_v9  ;;  %v1198_v15 = vld [vmem:[#allocation7 + $0x38] sm:$0xff]   ;;  %v85_v16 = vld [vmem:[#allocation2 + $0x10] sm:$0xff] }
  0x39   :  { %v116_v14 = vpack.c.bf16 %v98_v12, %v97_v11  ;;  %v86_v17 = vld [vmem:[#allocation2 + $0x18] sm:$0xff]  ;;  %v99_v18 = vld [vmem:[#allocation2 + $0x80] sm:$0xff]  ;;  %v100_v19 = vld [vmem:[#allocation2 + $0x88] sm:$0xff] }
  0x3a   :  { %v1199_v20 = vld [vmem:[#allocation7 + $0x30] sm:$0xff]   ;;  %v110_v21 = vpack.c.bf16 %v86_v17, %v85_v16  ;;  %v117_v22 = vpack.c.bf16 %v100_v19, %v99_v18  ;;  %v1200_v23 = vld [vmem:[#allocation7 + $0x28] sm:$0xff]   ;;  %v88_v25 = vld [vmem:[#allocation2 + $0x28] sm:$0xff] }
  0x3b   :  { %962 = vmatpush3.bf16.msra.mxu0 %v1191_v2  ;;  %1172 = vmatpush3.bf16.msra.mxu1 %v1191_v2  ;;  %v87_v24 = vld [vmem:[#allocation2 + $0x20] sm:$0xff]  ;;  %v101_v26 = vld [vmem:[#allocation2 + $0x90] sm:$0xff]  ;;  %v102_v27 = vld [vmem:[#allocation2 + $0x98] sm:$0xff] }
  0x3c   :  { %963 = vmatprep.subr.bf16.mxu0 %v1330_v0  ;;  %1165 = vmatprep.subr.bf16.mxu1 %v1330_v0  ;;  %v1201_v28 = vld [vmem:[#allocation7 + $0x20] sm:$0xff]   ;;  %v111_v29 = vpack.c.bf16 %v88_v25, %v87_v24  ;;  %v118_v30 = vpack.c.bf16 %v102_v27, %v101_v26  ;;  %v1202_v31 = vld [vmem:[#allocation7 + $0x18] sm:$0xff]   ;;  %v90_v33 = vld [vmem:[#allocation2 + $0x38] sm:$0xff] }
  0x3d   :  { %v89_v32 = vld [vmem:[#allocation2 + $0x30] sm:$0xff]  ;;  %v103_v34 = vld [vmem:[#allocation2 + $0xa0] sm:$0xff]  ;;  %v104_v35 = vld [vmem:[#allocation2 + $0xa8] sm:$0xff] }
  0x3e   :  { %v1203_v36 = vld [vmem:[#allocation7 + $0x10] sm:$0xff]   ;;  %v112_v37 = vpack.c.bf16 %v90_v33, %v89_v32  ;;  %v119_v38 = vpack.c.bf16 %v104_v35, %v103_v34  ;;  %v1204_v39 = vld [vmem:[#allocation7 + $0x8] sm:$0xff]   ;;  %v92_v41 = vld [vmem:[#allocation2 + $0x48] sm:$0xff] }
  0x3f   :  { %964 = vmatpush3.bf16.msra.mxu0 %v1192_v3  ;;  %1173 = vmatpush3.bf16.msra.mxu1 %v1192_v3  ;;  %v91_v40 = vld [vmem:[#allocation2 + $0x40] sm:$0xff]  ;;  %v105_v42 = vld [vmem:[#allocation2 + $0xb0] sm:$0xff]  ;;  %v106_v43 = vld [vmem:[#allocation2 + $0xb8] sm:$0xff] }
  0x40   :  { %965 = vmatprep.subr.bf16.mxu0 %v1330_v0  ;;  %1166 = vmatprep.subr.bf16.mxu1 %v1330_v0  ;;  %v113_v44 = vpack.c.bf16 %v92_v41, %v91_v40  ;;  %v120_v45 = vpack.c.bf16 %v106_v43, %v105_v42  ;;  %v93_v46 = vld [vmem:[#allocation2 + $0x50] sm:$0xff]  ;;  %v94_v47 = vld [vmem:[#allocation2 + $0x58] sm:$0xff]  ;;  %v107_v48 = vld [vmem:[#allocation2 + $0xc0] sm:$0xff] }
  0x41   :  { %v108_v49 = vld [vmem:[#allocation2 + $0xc8] sm:$0xff]  ;;  %v114_v50 = vpack.c.bf16 %v94_v47, %v93_v46  ;;  %v95_v52 = vld [vmem:[#allocation2 + $0x60] sm:$0xff]  ;;  %v1205_v55 = vld [vmem:[#allocation7] sm:$0xff]  }
  0x42   :  { %v121_v51 = vpack.c.bf16 %v108_v49, %v107_v48  ;;  %v96_v53 = vld [vmem:[#allocation2 + $0x68] sm:$0xff]  ;;  %v1207_v57 = vld [vmem:[#allocation8 + $0x30] sm:$0xff]   ;;  %v1208_v58 = vld [vmem:[#allocation8 + $0x28] sm:$0xff]  }
  0x43   :  { %966 = vmatpush3.bf16.msra.mxu0 %v1193_v4  ;;  %1174 = vmatpush3.bf16.msra.mxu1 %v1193_v4  ;;  %v115_v54 = vpack.c.bf16 %v96_v53, %v95_v52  ;;  %v1206_v56 = vld [vmem:[#allocation8 + $0x38] sm:$0xff]   ;;  %v1209_v59 = vld [vmem:[#allocation8 + $0x20] sm:$0xff]   ;;  %v1211_v61 = vld [vmem:[#allocation8 + $0x10] sm:$0xff]  }
  0x44   :  { %967 = vmatprep.subr.bf16.mxu0 %v1330_v0  ;;  %1167 = vmatprep.subr.bf16.mxu1 %v1330_v0  ;;  %v1210_v60 = vld [vmem:[#allocation8 + $0x18] sm:$0xff]   ;;  %v1460_v62 = vld [vmem:[%s1641_s2] ss:$0 sm:$0xff]  ;;  %v1212_v2 = vld [vmem:[#allocation8 + $0x8] sm:$0xff]  }
  0x47   :  { %968 = vmatpush3.bf16.msra.mxu0 %v1194_v5  ;;  %1175 = vmatpush3.bf16.msra.mxu1 %v1194_v5 }
  0x48   :  { %969 = vmatprep.subr.bf16.mxu0 %v1330_v0  ;;  %1168 = vmatprep.subr.bf16.mxu1 %v1330_v0 }
  0x4b   :  { %970 = vmatpush3.bf16.msra.mxu0 %v1195_v6  ;;  %1176 = vmatpush3.bf16.msra.mxu1 %v1195_v6 }
  0x4c   :  { %971 = vmatprep.subr.bf16.mxu0 %v1330_v0  ;;  %1169 = vmatprep.subr.bf16.mxu1 %v1330_v0 }
  0x4f   :  { %972 = vmatpush3.bf16.msra.mxu0 %v1196_v7  ;;  %1177 = vmatpush3.bf16.msra.mxu1 %v1196_v7 }
  0x50   :  { %973 = vmatprep.subr.bf16.mxu0 %v1330_v0  ;;  %1170 = vmatprep.subr.bf16.mxu1 %v1330_v0 }
  0x53   :  { %974 = vmatpush3.bf16.msra.mxu0 %v1197_v8  ;;  %1178 = vmatpush3.bf16.msra.mxu1 %v1197_v8 }
  0x54   :  { %1027 = vmatprep.subr.bf16.mxu1 %v1330_v0  ;;  %1095 = vmatprep.subr.bf16.mxu0 %v1330_v0 }
  0x56   :  { %976 = vmatmul.mubr.bf16.vlgmr.msra.gmra.mxu0 %v109_v13  ;;  %1004 = vmatmul.mubr.bf16.vlgmr.msra.gmra.mxu1 %v116_v14 }
  0x57   :  { %979 = vmatprep.mubr.msk.bf16.mxu0 %vm1331_vm0, %v1330_v0  ;;  %1007 = vmatprep.mubr.msk.bf16.mxu1 %vm1331_vm0, %v1330_v0 }
  0x58   :  { %1028 = vmatpush3.bf16.msra.mxu1 %v1198_v15  ;;  %1096 = vmatpush3.bf16.msra.mxu0 %v1206_v56 }
  0x59   :  { %1029 = vmatprep.subr.bf16.mxu1 %v1330_v0  ;;  %1097 = vmatprep.subr.bf16.mxu0 %v1330_v0 }
  0x5c   :  { %1030 = vmatpush3.bf16.msra.mxu1 %v1199_v20  ;;  %1098 = vmatpush3.bf16.msra.mxu0 %v1207_v57 }
  0x5d   :  { %1031 = vmatprep.subr.bf16.mxu1 %v1330_v0  ;;  %1099 = vmatprep.subr.bf16.mxu0 %v1330_v0 }
  0x5e   :  { %980 = vmatmul.mubr.bf16.gmra.mxu0 %v110_v21  ;;  %1008 = vmatmul.mubr.bf16.gmra.mxu1 %v117_v22 }
  0x5f   :  { %983 = vmatprep.mubr.msk.bf16.mxu0 %vm1331_vm0, %v1330_v0  ;;  %1011 = vmatprep.mubr.msk.bf16.mxu1 %vm1331_vm0, %v1330_v0 }
  0x60   :  { %1032 = vmatpush3.bf16.msra.mxu1 %v1200_v23  ;;  %1100 = vmatpush3.bf16.msra.mxu0 %v1208_v58 }
  0x61   :  { %1033 = vmatprep.subr.bf16.mxu1 %v1330_v0  ;;  %1101 = vmatprep.subr.bf16.mxu0 %v1330_v0 }
  0x64   :  { %1034 = vmatpush3.bf16.msra.mxu1 %v1201_v28  ;;  %1102 = vmatpush3.bf16.msra.mxu0 %v1209_v59 }
  0x65   :  { %1035 = vmatprep.subr.bf16.mxu1 %v1330_v0  ;;  %1103 = vmatprep.subr.bf16.mxu0 %v1330_v0 }
  0x66   :  { %984 = vmatmul.mubr.bf16.gmra.mxu0 %v111_v29  ;;  %1012 = vmatmul.mubr.bf16.gmra.mxu1 %v118_v30 }
  0x67   :  { %987 = vmatprep.mubr.msk.bf16.mxu0 %vm1331_vm0, %v1330_v0  ;;  %1015 = vmatprep.mubr.msk.bf16.mxu1 %vm1331_vm0, %v1330_v0 }
  0x68   :  { %1036 = vmatpush3.bf16.msra.mxu1 %v1202_v31  ;;  %1104 = vmatpush3.bf16.msra.mxu0 %v1210_v60 }
  0x69   :  { %1037 = vmatprep.subr.bf16.mxu1 %v1330_v0  ;;  %1105 = vmatprep.subr.bf16.mxu0 %v1330_v0 }
  0x6c   :  { %1038 = vmatpush3.bf16.msra.mxu1 %v1203_v36  ;;  %1106 = vmatpush3.bf16.msra.mxu0 %v1211_v61 }
  0x6d   :  { %1039 = vmatprep.subr.bf16.mxu1 %v1330_v0  ;;  %1107 = vmatprep.subr.bf16.mxu0 %v1330_v0 }
  0x6e   :  { %988 = vmatmul.mubr.bf16.gmra.mxu0 %v112_v37  ;;  %1016 = vmatmul.mubr.bf16.gmra.mxu1 %v119_v38 }
  0x6f   :  { %991 = vmatprep.mubr.msk.bf16.mxu0 %vm1331_vm0, %v1330_v0  ;;  %1019 = vmatprep.mubr.msk.bf16.mxu1 %vm1331_vm0, %v1330_v0 }
  0x70   :  { %1040 = vmatpush3.bf16.msra.mxu1 %v1204_v39  ;;  %1108 = vmatpush3.bf16.msra.mxu0 %v1212_v2 }
  0x71   :  { %1041 = vmatprep.subr.bf16.mxu1 %v1330_v0  ;;  %1109 = vmatprep.subr.bf16.mxu0 %v1330_v0 }
  0x74   :  { %1042 = vmatpush3.bf16.msra.mxu1 %v1205_v55 }
  0x76   :  { %992 = vmatmul.mubr.bf16.gmra.mxu0 %v113_v44  ;;  %1020 = vmatmul.mubr.bf16.gmra.mxu1 %v120_v45 }
  0x77   :  { %995 = vmatprep.mubr.msk.bf16.mxu0 %vm1331_vm0, %v1330_v0  ;;  %1023 = vmatprep.mubr.msk.bf16.mxu1 %vm1331_vm0, %v1330_v0 }
  0x7e   :  { %996 = vmatmul.mubr.bf16.gmra.mxu0 %v114_v50  ;;  %1024 = vmatmul.mubr.bf16.gmra.mxu1 %v121_v51 }
  0x7f   :  { %999 = vmatprep.mubr.msk.bf16.mxu0 %vm1331_vm0, %v1330_v0  ;;  %1043 = vmatprep.mubr.msk.bf16.mxu1 %vm1331_vm0, %v1330_v0 }
  0x86   :  { %1000 = vmatmul.mubr.bf16.gmra.mxu0 %v115_v54 }
  0x87   :  { %1111 = vmatprep.mubr.msk.bf16.mxu0 %vm1331_vm0, %v1330_v0 }
 0x116   :  { %v227_v63 = vpop.f32.mrf.mxu0  ;;  %v1462_v1 = vpop.f32.mrf.mxu1 }
 0x117   :  { %v228_v5 = vadd.f32 %v1460_v62, %v227_v63 }
 0x118   :  { %v977_v3 = vpop.f32.mrf.mxu0  ;;  %v1005_v4 = vpop.f32.mrf.mxu1 }
 0x119   :  { %v330_v11 = vmax.f32 %v228_v5, 0.0 }
 0x11a   :  { %v230_v6 = vpop.f32.mrf.mxu0  ;;  %v1466_v7 = vpop.f32.mrf.mxu1 }
 0x11b   :  { %v231_v8 = vadd.f32 %v1460_v62, %v230_v6 }
 0x11c   :  { %v978_v9 = vpop.f32.mrf.mxu0  ;;  %v1006_v10 = vpop.f32.mrf.mxu1 }
 0x11d   :  { %v331_v12 = vmax.f32 %v231_v8, 0.0 }
 0x11e   :  { %v235_v13 = vpop.f32.mrf.mxu0  ;;  %v1470_v14 = vpop.f32.mrf.mxu1 }
 0x11f   :  { %v356_v15 = vpack.c.bf16 %v331_v12, %v330_v11  ;;  %v236_v18 = vadd.f32 %v1460_v62, %v235_v13 }
 0x120   :  { %v981_v16 = vpop.f32.mrf.mxu0  ;;  %v1009_v17 = vpop.f32.mrf.mxu1 }
 0x121   :  { %1044 = vmatmul.mubr.bf16.vlgmr.msra.gmra.mxu1 %v356_v15  ;;  %v332_v24 = vmax.f32 %v236_v18, 0.0 }
 0x122   :  { %v238_v19 = vpop.f32.mrf.mxu0  ;;  %1047 = vmatprep.mubr.msk.bf16.mxu1 %vm1331_vm0, %v1330_v0  ;;  %v1475_v20 = vpop.f32.mrf.mxu1 }
 0x123   :  { %v239_v21 = vadd.f32 %v1460_v62, %v238_v19 }
 0x124   :  { %v982_v22 = vpop.f32.mrf.mxu0  ;;  %v1010_v23 = vpop.f32.mrf.mxu1 }
 0x125   :  { %v333_v25 = vmax.f32 %v239_v21, 0.0 }
 0x126   :  { %v243_v26 = vpop.f32.mrf.mxu0  ;;  %v1478_v27 = vpop.f32.mrf.mxu1 }
 0x127   :  { %v357_v28 = vpack.c.bf16 %v333_v25, %v332_v24  ;;  %v244_v31 = vadd.f32 %v1460_v62, %v243_v26 }
 0x128   :  { %v985_v29 = vpop.f32.mrf.mxu0  ;;  %v1013_v30 = vpop.f32.mrf.mxu1 }
 0x129   :  { %1048 = vmatmul.mubr.bf16.gmra.mxu1 %v357_v28  ;;  %v334_v37 = vmax.f32 %v244_v31, 0.0  ;;  %v284_v30 = vadd.f32 %v1460_v62, %v1462_v1 }
 0x12a   :  { %v246_v32 = vpop.f32.mrf.mxu0  ;;  %1051 = vmatprep.mubr.msk.bf16.mxu1 %vm1331_vm0, %v1330_v0  ;;  %v1483_v33 = vpop.f32.mrf.mxu1 }
 0x12b   :  { %v247_v34 = vadd.f32 %v1460_v62, %v246_v32  ;;  %v287_v32 = vadd.f32 %v1460_v62, %v1466_v7 }
 0x12c   :  { %v986_v35 = vpop.f32.mrf.mxu0  ;;  %v1014_v36 = vpop.f32.mrf.mxu1 }
 0x12d   :  { %v335_v38 = vmax.f32 %v247_v34, 0.0  ;;  %v344_v34 = vmax.f32 %v284_v30, 0.0  ;;  %v345_v35 = vmax.f32 %v287_v32, 0.0 }
 0x12e   :  { %v251_v39 = vpop.f32.mrf.mxu0  ;;  %v1486_v40 = vpop.f32.mrf.mxu1 }
 0x12f   :  { %v358_v41 = vpack.c.bf16 %v335_v38, %v334_v37  ;;  %v252_v44 = vadd.f32 %v1460_v62, %v251_v39  ;;  %v363_v36 = vpack.c.bf16 %v345_v35, %v344_v34  ;;  %v292_v37 = vadd.f32 %v1460_v62, %v1470_v14 }
 0x130   :  { %v989_v42 = vpop.f32.mrf.mxu0  ;;  %v1017_v43 = vpop.f32.mrf.mxu1  ;;  %v295_v38 = vadd.f32 %v1460_v62, %v1475_v20 }
 0x131   :  { %1052 = vmatmul.mubr.bf16.gmra.mxu1 %v358_v41  ;;  %v336_v50 = vmax.f32 %v252_v44, 0.0  ;;  %v346_v1 = vmax.f32 %v292_v37, 0.0  ;;  %v300_v41 = vadd.f32 %v1460_v62, %v1478_v27  ;;  %v303_v42 = vadd.f32 %v1460_v62, %v1483_v33 }
 0x132   :  { %v254_v45 = vpop.f32.mrf.mxu0  ;;  %1055 = vmatprep.mubr.msk.bf16.mxu1 %vm1331_vm0, %v1330_v0  ;;  %v1491_v46 = vpop.f32.mrf.mxu1  ;;  %v347_v39 = vmax.f32 %v295_v38, 0.0  ;;  %v308_v44 = vadd.f32 %v1460_v62, %v1486_v40 }
 0x133   :  { %v255_v47 = vadd.f32 %v1460_v62, %v254_v45  ;;  %v348_v14 = vmax.f32 %v300_v41, 0.0  ;;  %v349_v43 = vmax.f32 %v303_v42, 0.0  ;;  %v311_v45 = vadd.f32 %v1460_v62, %v1491_v46 }
 0x134   :  { %v990_v48 = vpop.f32.mrf.mxu0  ;;  %v1018_v49 = vpop.f32.mrf.mxu1  ;;  %v364_v7 = vpack.c.bf16 %v347_v39, %v346_v1  ;;  %v350_v27 = vmax.f32 %v308_v44, 0.0 }
 0x135   :  { %v337_v51 = vmax.f32 %v255_v47, 0.0  ;;  %v365_v20 = vpack.c.bf16 %v349_v43, %v348_v14  ;;  %v1213_v47 = vld [vmem:[#allocation8] sm:$0xff]   ;;  %v351_v33 = vmax.f32 %v311_v45, 0.0 }
 0x136   :  { %v259_v52 = vpop.f32.mrf.mxu0  ;;  %v1494_v53 = vpop.f32.mrf.mxu1  ;;  %1110 = vmatpush3.bf16.msra.mxu0 %v1213_v47 }
 0x137   :  { %v359_v54 = vpack.c.bf16 %v337_v51, %v336_v50  ;;  %v260_v57 = vadd.f32 %v1460_v62, %v259_v52  ;;  %v366_v48 = vpack.c.bf16 %v351_v33, %v350_v27  ;;  %v316_v49 = vadd.f32 %v1460_v62, %v1494_v53 }
 0x138   :  { %v993_v55 = vpop.f32.mrf.mxu0  ;;  %v1021_v56 = vpop.f32.mrf.mxu1 }
 0x139   :  { %1056 = vmatmul.mubr.bf16.gmra.mxu1 %v359_v54  ;;  %v338_v2 = vmax.f32 %v260_v57, 0.0  ;;  %v352_v40 = vmax.f32 %v316_v49, 0.0  ;;  %v1550_v57 = vld [vmem:[%s1643_s4] ss:$0 sm:$0xff] }
 0x13a   :  { %v262_v58 = vpop.f32.mrf.mxu0  ;;  %1059 = vmatprep.mubr.msk.bf16.mxu1 %vm1331_vm0, %v1330_v0  ;;  %v1499_v59 = vpop.f32.mrf.mxu1 }
 0x13b   :  { %v263_v60 = vadd.f32 %v1460_v62, %v262_v58  ;;  %v319_v50 = vadd.f32 %v1460_v62, %v1499_v59 }
 0x13c   :  { %v994_v61 = vpop.f32.mrf.mxu0  ;;  %v1022_v63 = vpop.f32.mrf.mxu1 }
 0x13d   :  { %v339_v3 = vmax.f32 %v263_v60, 0.0  ;;  %v353_v46 = vmax.f32 %v319_v50, 0.0 }
 0x13e   :  { %v267_v4 = vpop.f32.mrf.mxu0  ;;  %v1502_v5 = vpop.f32.mrf.mxu1 }
 0x13f   :  { %v360_v6 = vpack.c.bf16 %v339_v3, %v338_v2  ;;  %v268_v10 = vadd.f32 %v1460_v62, %v267_v4  ;;  %v367_v51 = vpack.c.bf16 %v353_v46, %v352_v40  ;;  %v324_v52 = vadd.f32 %v1460_v62, %v1502_v5 }
 0x140   :  { %v997_v8 = vpop.f32.mrf.mxu0  ;;  %v1025_v9 = vpop.f32.mrf.mxu1 }
 0x141   :  { %1060 = vmatmul.mubr.bf16.gmra.mxu1 %v360_v6  ;;  %v340_v17 = vmax.f32 %v268_v10, 0.0  ;;  %v354_v53 = vmax.f32 %v324_v52, 0.0 }
 0x142   :  { %v270_v11 = vpop.f32.mrf.mxu0  ;;  %1063 = vmatprep.mubr.msk.bf16.mxu1 %vm1331_vm0, %v1330_v0  ;;  %v326_v12 = vpop.f32.mrf.mxu1 }
 0x143   :  { %v271_v13 = vadd.f32 %v1460_v62, %v270_v11  ;;  %v327_v54 = vadd.f32 %v1460_v62, %v326_v12 }
 0x144   :  { %v998_v15 = vpop.f32.mrf.mxu0  ;;  %v1026_v16 = vpop.f32.mrf.mxu1 }
 0x145   :  { %v341_v18 = vmax.f32 %v271_v13, 0.0  ;;  %v355_v55 = vmax.f32 %v327_v54, 0.0 }
 0x146   :  { %v275_v19 = vpop.f32.mrf.mxu0 }
 0x147   :  { %v361_v21 = vpack.c.bf16 %v341_v18, %v340_v17  ;;  %v276_v23 = vadd.f32 %v1460_v62, %v275_v19  ;;  %v368_v56 = vpack.c.bf16 %v355_v55, %v354_v53 }
 0x148   :  { %v1001_v22 = vpop.f32.mrf.mxu0 }
 0x149   :  { %1064 = vmatmul.mubr.bf16.gmra.mxu1 %v361_v21  ;;  %v342_v28 = vmax.f32 %v276_v23, 0.0 }
 0x14a   :  { %v278_v24 = vpop.f32.mrf.mxu0  ;;  %1067 = vmatprep.mubr.msk.bf16.mxu1 %vm1331_vm0, %v1330_v0 }
 0x14b   :  { %v279_v25 = vadd.f32 %v1460_v62, %v278_v24 }
 0x14c   :  { %v1002_v26 = vpop.f32.mrf.mxu0 }
 0x14d   :  { %v343_v29 = vmax.f32 %v279_v25, 0.0 }
 0x14f   :  { %v362_v31 = vpack.c.bf16 %v343_v29, %v342_v28 }
 0x151   :  { %1068 = vmatmul.mubr.bf16.gmra.mxu1 %v362_v31 }
 0x152   :  { %1071 = vmatprep.mubr.msk.bf16.mxu1 %vm1331_vm0, %v1330_v0 }
 0x159   :  { %1072 = vmatmul.mubr.bf16.gmra.mxu1 %v363_v36 }
 0x15a   :  { %1075 = vmatprep.mubr.msk.bf16.mxu1 %vm1331_vm0, %v1330_v0 }
 0x161   :  { %1076 = vmatmul.mubr.bf16.gmra.mxu1 %v364_v7 }
 0x162   :  { %1079 = vmatprep.mubr.msk.bf16.mxu1 %vm1331_vm0, %v1330_v0 }
 0x169   :  { %1080 = vmatmul.mubr.bf16.gmra.mxu1 %v365_v20 }
 0x16a   :  { %1083 = vmatprep.mubr.msk.bf16.mxu1 %vm1331_vm0, %v1330_v0 }
 0x171   :  { %1084 = vmatmul.mubr.bf16.gmra.mxu1 %v366_v48 }
 0x172   :  { %1087 = vmatprep.mubr.msk.bf16.mxu1 %vm1331_vm0, %v1330_v0 }
 0x179   :  { %1088 = vmatmul.mubr.bf16.gmra.mxu1 %v367_v51 }
 0x17a   :  { %1091 = vmatprep.mubr.msk.bf16.mxu1 %vm1331_vm0, %v1330_v0 }
 0x181   :  { %1092 = vmatmul.mubr.bf16.gmra.mxu1 %v368_v56 }
 0x1e1   :  { %v474_v58 = vpop.f32.mrf.mxu1 }
 0x1e2   :  { %v475_v60 = vadd.f32 %v1550_v57, %v474_v58 }
 0x1e3   :  { %v1045_v59 = vpop.f32.mrf.mxu1 }
 0x1e4   :  { %v577_v2 = vmax.f32 %v475_v60, 0.0 }
 0x1e5   :  { %v477_v61 = vpop.f32.mrf.mxu1 }
 0x1e6   :  { %v478_v62 = vadd.f32 %v1550_v57, %v477_v61 }
 0x1e7   :  { %v1046_v63 = vpop.f32.mrf.mxu1 }
 0x1e8   :  { %v578_v3 = vmax.f32 %v478_v62, 0.0 }
 0x1e9   :  { %v482_v4 = vpop.f32.mrf.mxu1 }
 0x1ea   :  { %v603_v5 = vpack.c.bf16 %v578_v3, %v577_v2  ;;  %v483_v8 = vadd.f32 %v1550_v57, %v482_v4 }
 0x1eb   :  { %v1049_v6 = vpop.f32.mrf.mxu1 }
 0x1ec   :  { %1112 = vmatmul.mubr.bf16.vlgmr.msra.gmra.mxu0 %v603_v5  ;;  %v579_v12 = vmax.f32 %v483_v8, 0.0 }
 0x1ed   :  { %v485_v9 = vpop.f32.mrf.mxu1  ;;  %1115 = vmatprep.mubr.msk.bf16.mxu0 %vm1331_vm0, %v1330_v0 }
 0x1ee   :  { %v486_v10 = vadd.f32 %v1550_v57, %v485_v9 }
 0x1ef   :  { %v1050_v11 = vpop.f32.mrf.mxu1 }
 0x1f0   :  { %v580_v13 = vmax.f32 %v486_v10, 0.0 }
 0x1f1   :  { %v490_v15 = vpop.f32.mrf.mxu1 }
 0x1f2   :  { %v604_v16 = vpack.c.bf16 %v580_v13, %v579_v12  ;;  %v491_v18 = vadd.f32 %v1550_v57, %v490_v15 }
 0x1f3   :  { %v1053_v17 = vpop.f32.mrf.mxu1 }
 0x1f4   :  { %1116 = vmatmul.mubr.bf16.gmra.mxu0 %v604_v16  ;;  %v581_v23 = vmax.f32 %v491_v18, 0.0 }
 0x1f5   :  { %v493_v19 = vpop.f32.mrf.mxu1  ;;  %1119 = vmatprep.mubr.msk.bf16.mxu0 %vm1331_vm0, %v1330_v0 }
 0x1f6   :  { %v494_v21 = vadd.f32 %v1550_v57, %v493_v19 }
 0x1f7   :  { %v1054_v22 = vpop.f32.mrf.mxu1 }
 0x1f8   :  { %v582_v24 = vmax.f32 %v494_v21, 0.0 }
 0x1f9   :  { %v498_v25 = vpop.f32.mrf.mxu1 }
 0x1fa   :  { %v605_v26 = vpack.c.bf16 %v582_v24, %v581_v23  ;;  %v499_v29 = vadd.f32 %v1550_v57, %v498_v25 }
 0x1fb   :  { %v1057_v28 = vpop.f32.mrf.mxu1 }
 0x1fc   :  { %1120 = vmatmul.mubr.bf16.gmra.mxu0 %v605_v26  ;;  %v583_v34 = vmax.f32 %v499_v29, 0.0 }
 0x1fd   :  { %v501_v30 = vpop.f32.mrf.mxu1  ;;  %1123 = vmatprep.mubr.msk.bf16.mxu0 %vm1331_vm0, %v1330_v0 }
 0x1fe   :  { %v502_v31 = vadd.f32 %v1550_v57, %v501_v30 }
 0x1ff   :  { %v1058_v32 = vpop.f32.mrf.mxu1 }
 0x200   :  { %v584_v35 = vmax.f32 %v502_v31, 0.0 }
 0x201   :  { %v506_v36 = vpop.f32.mrf.mxu1 }
 0x202   :  { %v606_v37 = vpack.c.bf16 %v584_v35, %v583_v34  ;;  %v507_v1 = vadd.f32 %v1550_v57, %v506_v36 }
 0x203   :  { %v1061_v38 = vpop.f32.mrf.mxu1 }
 0x204   :  { %1124 = vmatmul.mubr.bf16.gmra.mxu0 %v606_v37  ;;  %v585_v42 = vmax.f32 %v507_v1, 0.0 }
 0x205   :  { %v509_v39 = vpop.f32.mrf.mxu1  ;;  %1127 = vmatprep.mubr.msk.bf16.mxu0 %vm1331_vm0, %v1330_v0 }
 0x206   :  { %v510_v7 = vadd.f32 %v1550_v57, %v509_v39 }
 0x207   :  { %v1062_v41 = vpop.f32.mrf.mxu1 }
 0x208   :  { %v586_v14 = vmax.f32 %v510_v7, 0.0 }
 0x209   :  { %v514_v43 = vpop.f32.mrf.mxu1 }
 0x20a   :  { %v607_v20 = vpack.c.bf16 %v586_v14, %v585_v42  ;;  %v515_v45 = vadd.f32 %v1550_v57, %v514_v43 }
 0x20b   :  { %v1065_v44 = vpop.f32.mrf.mxu1 }
 0x20c   :  { %1128 = vmatmul.mubr.bf16.gmra.mxu0 %v607_v20  ;;  %v587_v48 = vmax.f32 %v515_v45, 0.0 }
 0x20d   :  { %v517_v47 = vpop.f32.mrf.mxu1  ;;  %1131 = vmatprep.mubr.msk.bf16.mxu0 %vm1331_vm0, %v1330_v0 }
 0x20e   :  { %v518_v27 = vadd.f32 %v1550_v57, %v517_v47 }
 0x20f   :  { %v1066_v33 = vpop.f32.mrf.mxu1 }
 0x210   :  { %v588_v49 = vmax.f32 %v518_v27, 0.0 }
 0x211   :  { %v522_v50 = vpop.f32.mrf.mxu1 }
 0x212   :  { %v608_v40 = vpack.c.bf16 %v588_v49, %v587_v48  ;;  %v523_v51 = vadd.f32 %v1550_v57, %v522_v50 }
 0x213   :  { %v1069_v46 = vpop.f32.mrf.mxu1 }
 0x214   :  { %1132 = vmatmul.mubr.bf16.gmra.mxu0 %v608_v40  ;;  %v589_v55 = vmax.f32 %v523_v51, 0.0  ;;  %v1605_v46 = vld [vmem:[%s1645_s6] ss:$0 sm:$0xff]  ;;  %s1332_s6 = smov [#allocation10]  }
 0x215   :  { %v525_v52 = vpop.f32.mrf.mxu1  ;;  %1135 = vmatprep.mubr.msk.bf16.mxu0 %vm1331_vm0, %v1330_v0  ;;  %s855_s25 = sshll.u32 %s1332_s6, 4  ;;  %s856_s25 = int_to_ptr.vmem [resolvable:$true] %s855_s25 }
 0x216   :  { %v526_v54 = vadd.f32 %v1550_v57, %v525_v52  ;;  %s1294_s26 = scalar_lea.vmem %s856_s25, 3328  ;;  %p1299_p7 = scmp.lt.s32.totalorder %s856_s25, %s856_s25 }
 0x217   :  { %v1070_v53 = vpop.f32.mrf.mxu1  ;;  %p1295_p6 = scmp.ne.s32.totalorder %s856_s25, %s1294_s26  ;;  %p1300_p8 = scmp.lt.s32.totalorder %s1294_s26, %s1294_s26 }
 0x218   :  { %v590_v56 = vmax.f32 %v526_v54, 0.0 }
 0x219   :  { %v530_v58 = vpop.f32.mrf.mxu1  ;;  %p1301_p9 = por %p1300_p8, %p1299_p7 }
 0x21a   :  { %v609_v59 = vpack.c.bf16 %v590_v56, %v589_v55  ;;  %v531_v61 = vadd.f32 %v1550_v57, %v530_v58 }
 0x21b   :  { %v1073_v60 = vpop.f32.mrf.mxu1  ;;  %p1302_p10 = pnand %p1301_p9, %p1295_p6 }
 0x21c   :  { %1136 = vmatmul.mubr.bf16.gmra.mxu0 %v609_v59  ;;  %v591_v3 = vmax.f32 %v531_v61, 0.0 }
 0x21d   :  { %v533_v62 = vpop.f32.mrf.mxu1  ;;  %1139 = vmatprep.mubr.msk.bf16.mxu0 %vm1331_vm0, %v1330_v0 }
 0x21e   :  { %v534_v63 = vadd.f32 %v1550_v57, %v533_v62 }
 0x21f   :  { %v1074_v2 = vpop.f32.mrf.mxu1 }
 0x220   :  { %v592_v4 = vmax.f32 %v534_v63, 0.0 }
 0x221   :  { %v538_v5 = vpop.f32.mrf.mxu1 }
 0x222   :  { %v610_v6 = vpack.c.bf16 %v592_v4, %v591_v3  ;;  %v539_v9 = vadd.f32 %v1550_v57, %v538_v5 }
 0x223   :  { %v1077_v8 = vpop.f32.mrf.mxu1 }
 0x224   :  { %1140 = vmatmul.mubr.bf16.gmra.mxu0 %v610_v6  ;;  %v593_v13 = vmax.f32 %v539_v9, 0.0 }
 0x225   :  { %v541_v10 = vpop.f32.mrf.mxu1  ;;  %1143 = vmatprep.mubr.msk.bf16.mxu0 %vm1331_vm0, %v1330_v0 }
 0x226   :  { %v542_v11 = vadd.f32 %v1550_v57, %v541_v10 }
 0x227   :  { %v1078_v12 = vpop.f32.mrf.mxu1 }
 0x228   :  { %v594_v15 = vmax.f32 %v542_v11, 0.0 }
 0x229   :  { %v546_v16 = vpop.f32.mrf.mxu1 }
 0x22a   :  { %v611_v17 = vpack.c.bf16 %v594_v15, %v593_v13  ;;  %v547_v19 = vadd.f32 %v1550_v57, %v546_v16 }
 0x22b   :  { %v1081_v18 = vpop.f32.mrf.mxu1 }
 0x22c   :  { %1144 = vmatmul.mubr.bf16.gmra.mxu0 %v611_v17  ;;  %v595_v24 = vmax.f32 %v547_v19, 0.0 }
 0x22d   :  { %v549_v21 = vpop.f32.mrf.mxu1  ;;  %1147 = vmatprep.mubr.msk.bf16.mxu0 %vm1331_vm0, %v1330_v0 }
 0x22e   :  { %v550_v22 = vadd.f32 %v1550_v57, %v549_v21 }
 0x22f   :  { %v1082_v23 = vpop.f32.mrf.mxu1 }
 0x230   :  { %v596_v25 = vmax.f32 %v550_v22, 0.0 }
 0x231   :  { %v554_v26 = vpop.f32.mrf.mxu1 }
 0x232   :  { %v612_v28 = vpack.c.bf16 %v596_v25, %v595_v24  ;;  %v555_v30 = vadd.f32 %v1550_v57, %v554_v26 }
 0x233   :  { %v1085_v29 = vpop.f32.mrf.mxu1 }
 0x234   :  { %1148 = vmatmul.mubr.bf16.gmra.mxu0 %v612_v28  ;;  %v597_v35 = vmax.f32 %v555_v30, 0.0 }
 0x235   :  { %v557_v31 = vpop.f32.mrf.mxu1  ;;  %1151 = vmatprep.mubr.msk.bf16.mxu0 %vm1331_vm0, %v1330_v0 }
 0x236   :  { %v558_v32 = vadd.f32 %v1550_v57, %v557_v31 }
 0x237   :  { %v1086_v34 = vpop.f32.mrf.mxu1 }
 0x238   :  { %v598_v36 = vmax.f32 %v558_v32, 0.0 }
 0x239   :  { %v562_v37 = vpop.f32.mrf.mxu1 }
 0x23a   :  { %v613_v38 = vpack.c.bf16 %v598_v36, %v597_v35  ;;  %v563_v39 = vadd.f32 %v1550_v57, %v562_v37 }
 0x23b   :  { %v1089_v1 = vpop.f32.mrf.mxu1 }
 0x23c   :  { %1152 = vmatmul.mubr.bf16.gmra.mxu0 %v613_v38  ;;  %v599_v14 = vmax.f32 %v563_v39, 0.0 }
 0x23d   :  { %v565_v7 = vpop.f32.mrf.mxu1  ;;  %1155 = vmatprep.mubr.msk.bf16.mxu0 %vm1331_vm0, %v1330_v0 }
 0x23e   :  { %v566_v41 = vadd.f32 %v1550_v57, %v565_v7 }
 0x23f   :  { %v1090_v42 = vpop.f32.mrf.mxu1 }
 0x240   :  { %v600_v43 = vmax.f32 %v566_v41, 0.0 }
 0x241   :  { %v570_v20 = vpop.f32.mrf.mxu1 }
 0x242   :  { %v614_v44 = vpack.c.bf16 %v600_v43, %v599_v14  ;;  %v571_v47 = vadd.f32 %v1550_v57, %v570_v20 }
 0x243   :  { %v1093_v45 = vpop.f32.mrf.mxu1 }
 0x244   :  { %1156 = vmatmul.mubr.bf16.gmra.mxu0 %v614_v44  ;;  %v601_v49 = vmax.f32 %v571_v47, 0.0 }
 0x245   :  { %v573_v27 = vpop.f32.mrf.mxu1  ;;  %1159 = vmatprep.mubr.msk.bf16.mxu0 %vm1331_vm0, %v1330_v0 }
 0x246   :  { %v574_v33 = vadd.f32 %v1550_v57, %v573_v27 }
 0x247   :  { %v1094_v48 = vpop.f32.mrf.mxu1 }
 0x248   :  { %v602_v50 = vmax.f32 %v574_v33, 0.0 }
 0x24a   :  { %v615_v40 = vpack.c.bf16 %v602_v50, %v601_v49 }
 0x24c   :  { %1160 = vmatmul.mubr.bf16.gmra.mxu0 %v615_v40 }
 0x2ac   :  { %v721_v51 = vpop.f32.mrf.mxu0 }
 0x2ad   :  { %v722_v52 = vadd.f32 %v1605_v46, %v721_v51 }
 0x2ae   :  { %v1113_v54 = vpop.f32.mrf.mxu0 }
 0x2af   :  { %824 = vst [vmem:[#allocation10] sm:$0xff] %v722_v52 }
 0x2b0   :  { %v724_v53 = vpop.f32.mrf.mxu0 }
 0x2b1   :  { %v725_v0 = vadd.f32 %v1605_v46, %v724_v53 }
 0x2b2   :  { %v1114_v55 = vpop.f32.mrf.mxu0 }
 0x2b3   :  { %825 = vst [vmem:[#allocation10 + $0x8] sm:$0xff] %v725_v0 }
 0x2b4   :  { %v729_v57 = vpop.f32.mrf.mxu0 }
 0x2b5   :  { %v730_v56 = vadd.f32 %v1605_v46, %v729_v57 }
 0x2b6   :  { %v1117_v58 = vpop.f32.mrf.mxu0 }
 0x2b7   :  { %826 = vst [vmem:[#allocation10 + $0x10] sm:$0xff] %v730_v56 }
 0x2b8   :  { %v732_v59 = vpop.f32.mrf.mxu0 }
 0x2b9   :  { %v733_v60 = vadd.f32 %v1605_v46, %v732_v59 }
 0x2ba   :  { %v1118_v61 = vpop.f32.mrf.mxu0 }
 0x2bb   :  { %827 = vst [vmem:[#allocation10 + $0x18] sm:$0xff] %v733_v60 }
 0x2bc   :  { %v737_v62 = vpop.f32.mrf.mxu0 }
 0x2bd   :  { %v738_v63 = vadd.f32 %v1605_v46, %v737_v62 }
 0x2be   :  { %v1121_v2 = vpop.f32.mrf.mxu0 }
 0x2bf   :  { %828 = vst [vmem:[#allocation10 + $0x20] sm:$0xff] %v738_v63 }
 0x2c0   :  { %v740_v3 = vpop.f32.mrf.mxu0 }
 0x2c1   :  { %v741_v4 = vadd.f32 %v1605_v46, %v740_v3 }
 0x2c2   :  { %v1122_v5 = vpop.f32.mrf.mxu0 }
 0x2c3   :  { %829 = vst [vmem:[#allocation10 + $0x28] sm:$0xff] %v741_v4 }
 0x2c4   :  { %v745_v6 = vpop.f32.mrf.mxu0 }
 0x2c5   :  { %v746_v8 = vadd.f32 %v1605_v46, %v745_v6 }
 0x2c6   :  { %v1125_v9 = vpop.f32.mrf.mxu0 }
 0x2c7   :  { %830 = vst [vmem:[#allocation10 + $0x30] sm:$0xff] %v746_v8 }
 0x2c8   :  { %v748_v10 = vpop.f32.mrf.mxu0 }
 0x2c9   :  { %v749_v11 = vadd.f32 %v1605_v46, %v748_v10 }
 0x2ca   :  { %v1126_v12 = vpop.f32.mrf.mxu0 }
 0x2cb   :  { %831 = vst [vmem:[#allocation10 + $0x38] sm:$0xff] %v749_v11 }
 0x2cc   :  { %v753_v13 = vpop.f32.mrf.mxu0 }
 0x2cd   :  { %v754_v15 = vadd.f32 %v1605_v46, %v753_v13 }
 0x2ce   :  { %v1129_v16 = vpop.f32.mrf.mxu0 }
 0x2cf   :  { %832 = vst [vmem:[#allocation10 + $0x40] sm:$0xff] %v754_v15 }
 0x2d0   :  { %v756_v17 = vpop.f32.mrf.mxu0 }
 0x2d1   :  { %v757_v18 = vadd.f32 %v1605_v46, %v756_v17 }
 0x2d2   :  { %v1130_v19 = vpop.f32.mrf.mxu0 }
 0x2d3   :  { %833 = vst [vmem:[#allocation10 + $0x48] sm:$0xff] %v757_v18 }
 0x2d4   :  { %v761_v21 = vpop.f32.mrf.mxu0 }
 0x2d5   :  { %v762_v22 = vadd.f32 %v1605_v46, %v761_v21 }
 0x2d6   :  { %v1133_v23 = vpop.f32.mrf.mxu0 }
 0x2d7   :  { %834 = vst [vmem:[#allocation10 + $0x50] sm:$0xff] %v762_v22 }
 0x2d8   :  { %v764_v24 = vpop.f32.mrf.mxu0 }
 0x2d9   :  { %v765_v25 = vadd.f32 %v1605_v46, %v764_v24 }
 0x2da   :  { %v1134_v26 = vpop.f32.mrf.mxu0 }
 0x2db   :  { %835 = vst [vmem:[#allocation10 + $0x58] sm:$0xff] %v765_v25 }
 0x2dc   :  { %v769_v28 = vpop.f32.mrf.mxu0 }
 0x2dd   :  { %v770_v29 = vadd.f32 %v1605_v46, %v769_v28 }
 0x2de   :  { %v1137_v30 = vpop.f32.mrf.mxu0 }
 0x2df   :  { %836 = vst [vmem:[#allocation10 + $0x60] sm:$0xff] %v770_v29 }
 0x2e0   :  { %v772_v31 = vpop.f32.mrf.mxu0 }
 0x2e1   :  { %v773_v32 = vadd.f32 %v1605_v46, %v772_v31 }
 0x2e2   :  { %v1138_v34 = vpop.f32.mrf.mxu0 }
 0x2e3   :  { %837 = vst [vmem:[#allocation10 + $0x68] sm:$0xff] %v773_v32 }
 0x2e4   :  { %v777_v35 = vpop.f32.mrf.mxu0 }
 0x2e5   :  { %v778_v36 = vadd.f32 %v1605_v46, %v777_v35 }
 0x2e6   :  { %v1141_v37 = vpop.f32.mrf.mxu0 }
 0x2e7   :  { %838 = vst [vmem:[#allocation10 + $0x70] sm:$0xff] %v778_v36 }
 0x2e8   :  { %v780_v38 = vpop.f32.mrf.mxu0 }
 0x2e9   :  { %v781_v1 = vadd.f32 %v1605_v46, %v780_v38 }
 0x2ea   :  { %v1142_v39 = vpop.f32.mrf.mxu0 }
 0x2eb   :  { %839 = vst [vmem:[#allocation10 + $0x78] sm:$0xff] %v781_v1 }
 0x2ec   :  { %v785_v7 = vpop.f32.mrf.mxu0 }
 0x2ed   :  { %v786_v41 = vadd.f32 %v1605_v46, %v785_v7 }
 0x2ee   :  { %v1145_v42 = vpop.f32.mrf.mxu0 }
 0x2ef   :  { %840 = vst [vmem:[#allocation10 + $0x80] sm:$0xff] %v786_v41 }
 0x2f0   :  { %v788_v14 = vpop.f32.mrf.mxu0 }
 0x2f1   :  { %v789_v43 = vadd.f32 %v1605_v46, %v788_v14 }
 0x2f2   :  { %v1146_v20 = vpop.f32.mrf.mxu0 }
 0x2f3   :  { %841 = vst [vmem:[#allocation10 + $0x88] sm:$0xff] %v789_v43 }
 0x2f4   :  { %v793_v44 = vpop.f32.mrf.mxu0 }
 0x2f5   :  { %v794_v45 = vadd.f32 %v1605_v46, %v793_v44 }
 0x2f6   :  { %v1149_v47 = vpop.f32.mrf.mxu0 }
 0x2f7   :  { %842 = vst [vmem:[#allocation10 + $0x90] sm:$0xff] %v794_v45 }
 0x2f8   :  { %v796_v27 = vpop.f32.mrf.mxu0 }
 0x2f9   :  { %v797_v33 = vadd.f32 %v1605_v46, %v796_v27 }
 0x2fa   :  { %v1150_v48 = vpop.f32.mrf.mxu0 }
 0x2fb   :  { %843 = vst [vmem:[#allocation10 + $0x98] sm:$0xff] %v797_v33 }
 0x2fc   :  { %v801_v49 = vpop.f32.mrf.mxu0 }
 0x2fd   :  { %v802_v50 = vadd.f32 %v1605_v46, %v801_v49 }
 0x2fe   :  { %v1153_v40 = vpop.f32.mrf.mxu0 }
 0x2ff   :  { %844 = vst [vmem:[#allocation10 + $0xa0] sm:$0xff] %v802_v50 }
 0x300   :  { %v804_v51 = vpop.f32.mrf.mxu0 }
 0x301   :  { %v805_v52 = vadd.f32 %v1605_v46, %v804_v51 }
 0x302   :  { %v1154_v54 = vpop.f32.mrf.mxu0 }
 0x303   :  { %845 = vst [vmem:[#allocation10 + $0xa8] sm:$0xff] %v805_v52 }
 0x304   :  { %v809_v53 = vpop.f32.mrf.mxu0 }
 0x305   :  { %v810_v0 = vadd.f32 %v1605_v46, %v809_v53 }
 0x306   :  { %v1157_v55 = vpop.f32.mrf.mxu0 }
 0x307   :  { %846 = vst [vmem:[#allocation10 + $0xb0] sm:$0xff] %v810_v0 }
 0x308   :  { %v812_v57 = vpop.f32.mrf.mxu0 }
 0x309   :  { %v813_v56 = vadd.f32 %v1605_v46, %v812_v57 }
 0x30a   :  { %v1158_v58 = vpop.f32.mrf.mxu0 }
 0x30b   :  { %847 = vst [vmem:[#allocation10 + $0xb8] sm:$0xff] %v813_v56 }
 0x30c   :  { %v817_v59 = vpop.f32.mrf.mxu0 }
 0x30d   :  { %v818_v60 = vadd.f32 %v1605_v46, %v817_v59 }
 0x30e   :  { %v1161_v61 = vpop.f32.mrf.mxu0 }
 0x30f   :  { %848 = vst [vmem:[#allocation10 + $0xc0] sm:$0xff] %v818_v60 }
 0x310   :  { %v820_v62 = vpop.f32.mrf.mxu0 }
 0x311   :  { %v821_v63 = vadd.f32 %v1605_v46, %v820_v62 }
 0x312   :  { %v1162_v2 = vpop.f32.mrf.mxu0 }
 0x313   :  { %849 = vst [vmem:[#allocation10 + $0xc8] sm:$0xff] %v821_v63 }
 0x314   :  { %1305 = shalt.err (!%p1302_p10)
}
 0x315   :  { %861 = dma.vmem_to_hbm [thread:$0]  %s856_s25, 3328, %s1646_s7, [#allocation4], %s1326_s11, %s1326_s11, %s1327_s12  }
 0x316   :  { %1320 = dma.done.wait [#allocation4], 3328  }
 0x317   :  { %1321 = vsyncadd [#allocation4], 4294963968 }
 0x318   :  { %865 = vsyncpa [#allocation3], 1 }
 0x319   :  { %866 = vsyncpa [#allocation6], 1 }
 0x31a   :  { %867 = vsyncpa [#allocation9], 1 }
 0x31b   :  { %868 = vsyncpa [#allocation4], 1 }

// kernel: tpu_custom_call.1
= control target key start
LH: loop header
LB: loop body
LE: loop exit
PB: predicated region body
PF: predicated region fallthrough
CT: control target
= control target key end

     0   :  { %12 = vsyncpa [#allocation3], 0  ;;  %s1639_s0 = inlined_call_operand.hbm [shape: f32[208,128], index: 0, kind: input, shape index: {}]   ;;  %s1640_s1 = inlined_call_operand.hbm [shape: bf16[128,128], index: 1, kind: input, shape index: {}]   ;;  %s1641_s2 = inlined_call_operand.vmem [shape: f32[1,128], index: 2, kind: input, shape index: {}]   ;;  %s1642_s3 = inlined_call_operand.hbm [shape: bf16[128,128], index: 3, kind: input, shape index: {}]   ;;  %s1643_s4 = inlined_call_operand.vmem [shape: f32[1,128], index: 4, kind: input, shape index: {}]   ;;  %s1644_s5 = inlined_call_operand.hbm [shape: bf16[128,128], index: 5, kind: input, shape index: {}]   ;;  %s1645_s6 = inlined_call_operand.vmem [shape: f32[1,128], index: 6, kind: input, shape index: {}]   ;;  %s1646_s7 = inlined_call_operand.hbm [shape: f32[208,128], index: 7, kind: output, shape index: {}]  }
   0x1   :  { %13 = vsyncpa [#allocation6], 0 }
   0x2   :  { %14 = vsyncpa [#allocation9], 0 }
   0x3   :  { %15 = vsyncpa [#allocation4], 0  ;;  %s1322_s24 = smov [#allocation5]  }
   0x4   :  { %s33_s25 = sshll.u32 %s1322_s24, 4  ;;  %s34_s25 = int_to_ptr.vmem [resolvable:$true] %s33_s25 }
   0x5   :  { %s1222_s26 = scalar_lea.vmem %s34_s25, 1024  ;;  %p1227_p1 = scmp.lt.s32.totalorder %s34_s25, %s34_s25 }
   0x6   :  { %p1223_p0 = scmp.ne.s32.totalorder %s34_s25, %s1222_s26  ;;  %p1228_p2 = scmp.lt.s32.totalorder %s1222_s26, %s1222_s26 }
   0x8   :  { %p1229_p3 = por %p1228_p2, %p1227_p1 }
   0xa   :  { %p1230_p4 = pnand %p1229_p3, %p1223_p0 }
   0xc   :  { %1233 = shalt.err (!%p1230_p4)
}
   0xd   :  { %s1323_s27 = smov 64   ;;  %s1324_s28 = smov 4  }
   0xe   :  { %39 = dma.hbm_to_vmem [thread:$0]  %s1640_s1, 1024, %s34_s25, [#allocation6], %s1323_s27, %s1323_s27, %s1324_s28  }
   0xf   :  { %s1325_s8 = smov [#allocation2]  }
  0x10   :  { %s21_s9 = sshll.u32 %s1325_s8, 4  ;;  %s22_s9 = int_to_ptr.vmem [resolvable:$true] %s21_s9 }
  0x11   :  { %s1242_s10 = scalar_lea.vmem %s22_s9, 3328  ;;  %p1247_p6 = scmp.lt.s32.totalorder %s22_s9, %s22_s9 }
  0x12   :  { %p1243_p5 = scmp.ne.s32.totalorder %s22_s9, %s1242_s10  ;;  %p1248_p7 = scmp.lt.s32.totalorder %s1242_s10, %s1242_s10 }
  0x14   :  { %p1249_p8 = por %p1248_p7, %p1247_p6 }
  0x16   :  { %p1250_p9 = pnand %p1249_p8, %p1243_p5 }
  0x18   :  { %1253 = shalt.err (!%p1250_p9)
}
  0x19   :  { %s1326_s11 = smov 128   ;;  %s1327_s12 = smov 8  }
  0x1a   :  { %27 = dma.hbm_to_vmem [thread:$0]  %s1639_s0, 3328, %s22_s9, [#allocation3], %s1326_s11, %s1326_s11, %s1327_s12  }
  0x1b   :  { %s1328_s1 = smov [#allocation7]   ;;  %s1329_s16 = smov [#allocation8]  }
  0x1c   :  { %s47_s15 = sshll.u32 %s1328_s1, 4  ;;  %s61_s17 = sshll.u32 %s1329_s16, 4  ;;  %s48_s15 = int_to_ptr.vmem [resolvable:$true] %s47_s15  ;;  %s62_s17 = int_to_ptr.vmem [resolvable:$true] %s61_s17 }
  0x1d   :  { %s1262_s18 = scalar_lea.vmem %s48_s15, 1024  ;;  %p1267_p11 = scmp.lt.s32.totalorder %s48_s15, %s48_s15 }
  0x1e   :  { %p1263_p10 = scmp.ne.s32.totalorder %s48_s15, %s1262_s18  ;;  %p1268_p12 = scmp.lt.s32.totalorder %s1262_s18, %s1262_s18 }
  0x20   :  { %p1269_p13 = por %p1268_p12, %p1267_p11 }
  0x22   :  { %p1270_p0 = pnand %p1269_p13, %p1263_p10 }
  0x24   :  { %1273 = shalt.err (!%p1270_p0)
}
  0x25   :  { %53 = dma.hbm_to_vmem [thread:$0]  %s1642_s3, 1024, %s48_s15, [#allocation6], %s1323_s27, %s1323_s27, %s1324_s28  }
  0x26   :  { %s1282_s0 = scalar_lea.vmem %s62_s17, 1024  ;;  %p1287_p2 = scmp.lt.s32.totalorder %s62_s17, %s62_s17 }
  0x27   :  { %p1283_p1 = scmp.ne.s32.totalorder %s62_s17, %s1282_s0  ;;  %p1288_p3 = scmp.lt.s32.totalorder %s1282_s0, %s1282_s0 }
  0x29   :  { %p1289_p4 = por %p1288_p3, %p1287_p2 }
  0x2b   :  { %p1290_p5 = pnand %p1289_p4, %p1283_p1 }
  0x2d   :  { %1293 = shalt.err (!%p1290_p5)
}
  0x2e   :  { %67 = dma.hbm_to_vmem [thread:$0]  %s1644_s5, 1024, %s62_s17, [#allocation9], %s1323_s27, %s1323_s27, %s1324_s28  }
  0x2f   :  { %1314 = dma.done.wait [#allocation3], 3328  }
  0x30   :  { %1315 = vsyncadd [#allocation3], 4294963968 }
  0x31   :  { %1316 = dma.done.wait [#allocation6], 2048  }
  0x32   :  { %1317 = vsyncadd [#allocation6], 4294965248 }
  0x33   :  { %1318 = dma.done.wait [#allocation9], 1024  }
  0x34   :  { %1319 = vsyncadd [#allocation9], 4294966272  ;;  %v1330_v0 = vmov 0.0   ;;  %vm1331_vm0 = vmmov 0   ;;  %v1190_v1 = vld [vmem:[#allocation5 + $0x38] sm:$0xff]   ;;  %v1191_v2 = vld [vmem:[#allocation5 + $0x30] sm:$0xff]  }
  0x35   :  { %959 = vmatprep.subr.bf16.mxu0 %v1330_v0  ;;  %975 = vmatprep.mubr.msk.bf16.mxu0 %vm1331_vm0, %v1330_v0  ;;  %v1192_v3 = vld [vmem:[#allocation5 + $0x28] sm:$0xff]   ;;  %v1193_v4 = vld [vmem:[#allocation5 + $0x20] sm:$0xff]   ;;  %v1194_v5 = vld [vmem:[#allocation5 + $0x18] sm:$0xff]  }
  0x36   :  { %1163 = vmatprep.subr.bf16.mxu1 %v1330_v0  ;;  %1003 = vmatprep.mubr.msk.bf16.mxu1 %vm1331_vm0, %v1330_v0  ;;  %v1195_v6 = vld [vmem:[#allocation5 + $0x10] sm:$0xff]   ;;  %v1196_v7 = vld [vmem:[#allocation5 + $0x8] sm:$0xff]   ;;  %v1197_v8 = vld [vmem:[#allocation5] sm:$0xff]  }
  0x37   :  { %960 = vmatpush3.bf16.msra.mxu0 %v1190_v1  ;;  %1171 = vmatpush3.bf16.msra.mxu1 %v1190_v1  ;;  %v83_v9 = vld [vmem:[#allocation2] sm:$0xff]  ;;  %v84_v10 = vld [vmem:[#allocation2 + $0x8] sm:$0xff]  ;;  %v97_v11 = vld [vmem:[#allocation2 + $0x70] sm:$0xff] }
  0x38   :  { %961 = vmatprep.subr.bf16.mxu0 %v1330_v0  ;;  %1164 = vmatprep.subr.bf16.mxu1 %v1330_v0  ;;  %v98_v12 = vld [vmem:[#allocation2 + $0x78] sm:$0xff]  ;;  %v109_v13 = vpack.c.bf16 %v84_v10, %v83_v9  ;;  %v1198_v15 = vld [vmem:[#allocation7 + $0x38] sm:$0xff]   ;;  %v85_v16 = vld [vmem:[#allocation2 + $0x10] sm:$0xff] }
  0x39   :  { %v116_v14 = vpack.c.bf16 %v98_v12, %v97_v11  ;;  %v86_v17 = vld [vmem:[#allocation2 + $0x18] sm:$0xff]  ;;  %v99_v18 = vld [vmem:[#allocation2 + $0x80] sm:$0xff]  ;;  %v100_v19 = vld [vmem:[#allocation2 + $0x88] sm:$0xff] }
  0x3a   :  { %v1199_v20 = vld [vmem:[#allocation7 + $0x30] sm:$0xff]   ;;  %v110_v21 = vpack.c.bf16 %v86_v17, %v85_v16  ;;  %v117_v22 = vpack.c.bf16 %v100_v19, %v99_v18  ;;  %v1200_v23 = vld [vmem:[#allocation7 + $0x28] sm:$0xff]   ;;  %v88_v25 = vld [vmem:[#allocation2 + $0x28] sm:$0xff] }
  0x3b   :  { %962 = vmatpush3.bf16.msra.mxu0 %v1191_v2  ;;  %1172 = vmatpush3.bf16.msra.mxu1 %v1191_v2  ;;  %v87_v24 = vld [vmem:[#allocation2 + $0x20] sm:$0xff]  ;;  %v101_v26 = vld [vmem:[#allocation2 + $0x90] sm:$0xff]  ;;  %v102_v27 = vld [vmem:[#allocation2 + $0x98] sm:$0xff] }
  0x3c   :  { %963 = vmatprep.subr.bf16.mxu0 %v1330_v0  ;;  %1165 = vmatprep.subr.bf16.mxu1 %v1330_v0  ;;  %v1201_v28 = vld [vmem:[#allocation7 + $0x20] sm:$0xff]   ;;  %v111_v29 = vpack.c.bf16 %v88_v25, %v87_v24  ;;  %v118_v30 = vpack.c.bf16 %v102_v27, %v101_v26  ;;  %v1202_v31 = vld [vmem:[#allocation7 + $0x18] sm:$0xff]   ;;  %v90_v33 = vld [vmem:[#allocation2 + $0x38] sm:$0xff] }
  0x3d   :  { %v89_v32 = vld [vmem:[#allocation2 + $0x30] sm:$0xff]  ;;  %v103_v34 = vld [vmem:[#allocation2 + $0xa0] sm:$0xff]  ;;  %v104_v35 = vld [vmem:[#allocation2 + $0xa8] sm:$0xff] }
  0x3e   :  { %v1203_v36 = vld [vmem:[#allocation7 + $0x10] sm:$0xff]   ;;  %v112_v37 = vpack.c.bf16 %v90_v33, %v89_v32  ;;  %v119_v38 = vpack.c.bf16 %v104_v35, %v103_v34  ;;  %v1204_v39 = vld [vmem:[#allocation7 + $0x8] sm:$0xff]   ;;  %v92_v41 = vld [vmem:[#allocation2 + $0x48] sm:$0xff] }
  0x3f   :  { %964 = vmatpush3.bf16.msra.mxu0 %v1192_v3  ;;  %1173 = vmatpush3.bf16.msra.mxu1 %v1192_v3  ;;  %v91_v40 = vld [vmem:[#allocation2 + $0x40] sm:$0xff]  ;;  %v105_v42 = vld [vmem:[#allocation2 + $0xb0] sm:$0xff]  ;;  %v106_v43 = vld [vmem:[#allocation2 + $0xb8] sm:$0xff] }
  0x40   :  { %965 = vmatprep.subr.bf16.mxu0 %v1330_v0  ;;  %1166 = vmatprep.subr.bf16.mxu1 %v1330_v0  ;;  %v113_v44 = vpack.c.bf16 %v92_v41, %v91_v40  ;;  %v120_v45 = vpack.c.bf16 %v106_v43, %v105_v42  ;;  %v93_v46 = vld [vmem:[#allocation2 + $0x50] sm:$0xff]  ;;  %v94_v47 = vld [vmem:[#allocation2 + $0x58] sm:$0xff]  ;;  %v107_v48 = vld [vmem:[#allocation2 + $0xc0] sm:$0xff] }
  0x41   :  { %v108_v49 = vld [vmem:[#allocation2 + $0xc8] sm:$0xff]  ;;  %v114_v50 = vpack.c.bf16 %v94_v47, %v93_v46  ;;  %v95_v52 = vld [vmem:[#allocation2 + $0x60] sm:$0xff]  ;;  %v1205_v55 = vld [vmem:[#allocation7] sm:$0xff]  }
  0x42   :  { %v121_v51 = vpack.c.bf16 %v108_v49, %v107_v48  ;;  %v96_v53 = vld [vmem:[#allocation2 + $0x68] sm:$0xff]  ;;  %v1207_v57 = vld [vmem:[#allocation8 + $0x30] sm:$0xff]   ;;  %v1208_v58 = vld [vmem:[#allocation8 + $0x28] sm:$0xff]  }
  0x43   :  { %966 = vmatpush3.bf16.msra.mxu0 %v1193_v4  ;;  %1174 = vmatpush3.bf16.msra.mxu1 %v1193_v4  ;;  %v115_v54 = vpack.c.bf16 %v96_v53, %v95_v52  ;;  %v1206_v56 = vld [vmem:[#allocation8 + $0x38] sm:$0xff]   ;;  %v1209_v59 = vld [vmem:[#allocation8 + $0x20] sm:$0xff]   ;;  %v1211_v61 = vld [vmem:[#allocation8 + $0x10] sm:$0xff]  }
  0x44   :  { %967 = vmatprep.subr.bf16.mxu0 %v1330_v0  ;;  %1167 = vmatprep.subr.bf16.mxu1 %v1330_v0  ;;  %v1210_v60 = vld [vmem:[#allocation8 + $0x18] sm:$0xff]   ;;  %v1460_v62 = vld [vmem:[%s1641_s2] ss:$0 sm:$0xff]  ;;  %v1212_v2 = vld [vmem:[#allocation8 + $0x8] sm:$0xff]  }
  0x47   :  { %968 = vmatpush3.bf16.msra.mxu0 %v1194_v5  ;;  %1175 = vmatpush3.bf16.msra.mxu1 %v1194_v5 }
  0x48   :  { %969 = vmatprep.subr.bf16.mxu0 %v1330_v0  ;;  %1168 = vmatprep.subr.bf16.mxu1 %v1330_v0 }
  0x4b   :  { %970 = vmatpush3.bf16.msra.mxu0 %v1195_v6  ;;  %1176 = vmatpush3.bf16.msra.mxu1 %v1195_v6 }
  0x4c   :  { %971 = vmatprep.subr.bf16.mxu0 %v1330_v0  ;;  %1169 = vmatprep.subr.bf16.mxu1 %v1330_v0 }
  0x4f   :  { %972 = vmatpush3.bf16.msra.mxu0 %v1196_v7  ;;  %1177 = vmatpush3.bf16.msra.mxu1 %v1196_v7 }
  0x50   :  { %973 = vmatprep.subr.bf16.mxu0 %v1330_v0  ;;  %1170 = vmatprep.subr.bf16.mxu1 %v1330_v0 }
  0x53   :  { %974 = vmatpush3.bf16.msra.mxu0 %v1197_v8  ;;  %1178 = vmatpush3.bf16.msra.mxu1 %v1197_v8 }
  0x54   :  { %1027 = vmatprep.subr.bf16.mxu1 %v1330_v0  ;;  %1095 = vmatprep.subr.bf16.mxu0 %v1330_v0 }
  0x56   :  { %976 = vmatmul.mubr.bf16.vlgmr.msra.gmra.mxu0 %v109_v13  ;;  %1004 = vmatmul.mubr.bf16.vlgmr.msra.gmra.mxu1 %v116_v14 }
  0x57   :  { %979 = vmatprep.mubr.msk.bf16.mxu0 %vm1331_vm0, %v1330_v0  ;;  %1007 = vmatprep.mubr.msk.bf16.mxu1 %vm1331_vm0, %v1330_v0 }
  0x58   :  { %1028 = vmatpush3.bf16.msra.mxu1 %v1198_v15  ;;  %1096 = vmatpush3.bf16.msra.mxu0 %v1206_v56 }
  0x59   :  { %1029 = vmatprep.subr.bf16.mxu1 %v1330_v0  ;;  %1097 = vmatprep.subr.bf16.mxu0 %v1330_v0 }
  0x5c   :  { %1030 = vmatpush3.bf16.msra.mxu1 %v1199_v20  ;;  %1098 = vmatpush3.bf16.msra.mxu0 %v1207_v57 }
  0x5d   :  { %1031 = vmatprep.subr.bf16.mxu1 %v1330_v0  ;;  %1099 = vmatprep.subr.bf16.mxu0 %v1330_v0 }
  0x5e   :  { %980 = vmatmul.mubr.bf16.gmra.mxu0 %v110_v21  ;;  %1008 = vmatmul.mubr.bf16.gmra.mxu1 %v117_v22 }
  0x5f   :  { %983 = vmatprep.mubr.msk.bf16.mxu0 %vm1331_vm0, %v1330_v0  ;;  %1011 = vmatprep.mubr.msk.bf16.mxu1 %vm1331_vm0, %v1330_v0 }
  0x60   :  { %1032 = vmatpush3.bf16.msra.mxu1 %v1200_v23  ;;  %1100 = vmatpush3.bf16.msra.mxu0 %v1208_v58 }
  0x61   :  { %1033 = vmatprep.subr.bf16.mxu1 %v1330_v0  ;;  %1101 = vmatprep.subr.bf16.mxu0 %v1330_v0 }
  0x64   :  { %1034 = vmatpush3.bf16.msra.mxu1 %v1201_v28  ;;  %1102 = vmatpush3.bf16.msra.mxu0 %v1209_v59 }
  0x65   :  { %1035 = vmatprep.subr.bf16.mxu1 %v1330_v0  ;;  %1103 = vmatprep.subr.bf16.mxu0 %v1330_v0 }
  0x66   :  { %984 = vmatmul.mubr.bf16.gmra.mxu0 %v111_v29  ;;  %1012 = vmatmul.mubr.bf16.gmra.mxu1 %v118_v30 }
  0x67   :  { %987 = vmatprep.mubr.msk.bf16.mxu0 %vm1331_vm0, %v1330_v0  ;;  %1015 = vmatprep.mubr.msk.bf16.mxu1 %vm1331_vm0, %v1330_v0 }
  0x68   :  { %1036 = vmatpush3.bf16.msra.mxu1 %v1202_v31  ;;  %1104 = vmatpush3.bf16.msra.mxu0 %v1210_v60 }
  0x69   :  { %1037 = vmatprep.subr.bf16.mxu1 %v1330_v0  ;;  %1105 = vmatprep.subr.bf16.mxu0 %v1330_v0 }
  0x6c   :  { %1038 = vmatpush3.bf16.msra.mxu1 %v1203_v36  ;;  %1106 = vmatpush3.bf16.msra.mxu0 %v1211_v61 }
  0x6d   :  { %1039 = vmatprep.subr.bf16.mxu1 %v1330_v0  ;;  %1107 = vmatprep.subr.bf16.mxu0 %v1330_v0 }
  0x6e   :  { %988 = vmatmul.mubr.bf16.gmra.mxu0 %v112_v37  ;;  %1016 = vmatmul.mubr.bf16.gmra.mxu1 %v119_v38 }
  0x6f   :  { %991 = vmatprep.mubr.msk.bf16.mxu0 %vm1331_vm0, %v1330_v0  ;;  %1019 = vmatprep.mubr.msk.bf16.mxu1 %vm1331_vm0, %v1330_v0 }
  0x70   :  { %1040 = vmatpush3.bf16.msra.mxu1 %v1204_v39  ;;  %1108 = vmatpush3.bf16.msra.mxu0 %v1212_v2 }
  0x71   :  { %1041 = vmatprep.subr.bf16.mxu1 %v1330_v0  ;;  %1109 = vmatprep.subr.bf16.mxu0 %v1330_v0 }
  0x74   :  { %1042 = vmatpush3.bf16.msra.mxu1 %v1205_v55 }
  0x76   :  { %992 = vmatmul.mubr.bf16.gmra.mxu0 %v113_v44  ;;  %1020 = vmatmul.mubr.bf16.gmra.mxu1 %v120_v45 }
  0x77   :  { %995 = vmatprep.mubr.msk.bf16.mxu0 %vm1331_vm0, %v1330_v0  ;;  %1023 = vmatprep.mubr.msk.bf16.mxu1 %vm1331_vm0, %v1330_v0 }
  0x7e   :  { %996 = vmatmul.mubr.bf16.gmra.mxu0 %v114_v50  ;;  %1024 = vmatmul.mubr.bf16.gmra.mxu1 %v121_v51 }
  0x7f   :  { %999 = vmatprep.mubr.msk.bf16.mxu0 %vm1331_vm0, %v1330_v0  ;;  %1043 = vmatprep.mubr.msk.bf16.mxu1 %vm1331_vm0, %v1330_v0 }
  0x86   :  { %1000 = vmatmul.mubr.bf16.gmra.mxu0 %v115_v54 }
  0x87   :  { %1111 = vmatprep.mubr.msk.bf16.mxu0 %vm1331_vm0, %v1330_v0 }
 0x116   :  { %v227_v63 = vpop.f32.mrf.mxu0  ;;  %v1462_v1 = vpop.f32.mrf.mxu1 }
 0x117   :  { %v228_v5 = vadd.f32 %v1460_v62, %v227_v63 }
 0x118   :  { %v977_v3 = vpop.f32.mrf.mxu0  ;;  %v1005_v4 = vpop.f32.mrf.mxu1 }
 0x119   :  { %v330_v11 = vmax.f32 %v228_v5, 0.0 }
 0x11a   :  { %v230_v6 = vpop.f32.mrf.mxu0  ;;  %v1466_v7 = vpop.f32.mrf.mxu1 }
 0x11b   :  { %v231_v8 = vadd.f32 %v1460_v62, %v230_v6 }
 0x11c   :  { %v978_v9 = vpop.f32.mrf.mxu0  ;;  %v1006_v10 = vpop.f32.mrf.mxu1 }
 0x11d   :  { %v331_v12 = vmax.f32 %v231_v8, 0.0 }
 0x11e   :  { %v235_v13 = vpop.f32.mrf.mxu0  ;;  %v1470_v14 = vpop.f32.mrf.mxu1 }
 0x11f   :  { %v356_v15 = vpack.c.bf16 %v331_v12, %v330_v11  ;;  %v236_v18 = vadd.f32 %v1460_v62, %v235_v13 }
 0x120   :  { %v981_v16 = vpop.f32.mrf.mxu0  ;;  %v1009_v17 = vpop.f32.mrf.mxu1 }
 0x121   :  { %1044 = vmatmul.mubr.bf16.vlgmr.msra.gmra.mxu1 %v356_v15  ;;  %v332_v24 = vmax.f32 %v236_v18, 0.0 }
 0x122   :  { %v238_v19 = vpop.f32.mrf.mxu0  ;;  %1047 = vmatprep.mubr.msk.bf16.mxu1 %vm1331_vm0, %v1330_v0  ;;  %v1475_v20 = vpop.f32.mrf.mxu1 }
 0x123   :  { %v239_v21 = vadd.f32 %v1460_v62, %v238_v19 }
 0x124   :  { %v982_v22 = vpop.f32.mrf.mxu0  ;;  %v1010_v23 = vpop.f32.mrf.mxu1 }
 0x125   :  { %v333_v25 = vmax.f32 %v239_v21, 0.0 }
 0x126   :  { %v243_v26 = vpop.f32.mrf.mxu0  ;;  %v1478_v27 = vpop.f32.mrf.mxu1 }
 0x127   :  { %v357_v28 = vpack.c.bf16 %v333_v25, %v332_v24  ;;  %v244_v31 = vadd.f32 %v1460_v62, %v243_v26 }
 0x128   :  { %v985_v29 = vpop.f32.mrf.mxu0  ;;  %v1013_v30 = vpop.f32.mrf.mxu1 }
 0x129   :  { %1048 = vmatmul.mubr.bf16.gmra.mxu1 %v357_v28  ;;  %v334_v37 = vmax.f32 %v244_v31, 0.0  ;;  %v284_v30 = vadd.f32 %v1460_v62, %v1462_v1 }
 0x12a   :  { %v246_v32 = vpop.f32.mrf.mxu0  ;;  %1051 = vmatprep.mubr.msk.bf16.mxu1 %vm1331_vm0, %v1330_v0  ;;  %v1483_v33 = vpop.f32.mrf.mxu1 }
 0x12b   :  { %v247_v34 = vadd.f32 %v1460_v62, %v246_v32  ;;  %v287_v32 = vadd.f32 %v1460_v62, %v1466_v7 }
 0x12c   :  { %v986_v35 = vpop.f32.mrf.mxu0  ;;  %v1014_v36 = vpop.f32.mrf.mxu1 }
 0x12d   :  { %v335_v38 = vmax.f32 %v247_v34, 0.0  ;;  %v344_v34 = vmax.f32 %v284_v30, 0.0  ;;  %v345_v35 = vmax.f32 %v287_v32, 0.0 }
 0x12e   :  { %v251_v39 = vpop.f32.mrf.mxu0  ;;  %v1486_v40 = vpop.f32.mrf.mxu1 }
 0x12f   :  { %v358_v41 = vpack.c.bf16 %v335_v38, %v334_v37  ;;  %v252_v44 = vadd.f32 %v1460_v62, %v251_v39  ;;  %v363_v36 = vpack.c.bf16 %v345_v35, %v344_v34  ;;  %v292_v37 = vadd.f32 %v1460_v62, %v1470_v14 }
 0x130   :  { %v989_v42 = vpop.f32.mrf.mxu0  ;;  %v1017_v43 = vpop.f32.mrf.mxu1  ;;  %v295_v38 = vadd.f32 %v1460_v62, %v1475_v20 }
 0x131   :  { %1052 = vmatmul.mubr.bf16.gmra.mxu1 %v358_v41  ;;  %v336_v50 = vmax.f32 %v252_v44, 0.0  ;;  %v346_v1 = vmax.f32 %v292_v37, 0.0  ;;  %v300_v41 = vadd.f32 %v1460_v62, %v1478_v27  ;;  %v303_v42 = vadd.f32 %v1460_v62, %v1483_v33 }
 0x132   :  { %v254_v45 = vpop.f32.mrf.mxu0  ;;  %1055 = vmatprep.mubr.msk.bf16.mxu1 %vm1331_vm0, %v1330_v0  ;;  %v1491_v46 = vpop.f32.mrf.mxu1  ;;  %v347_v39 = vmax.f32 %v295_v38, 0.0  ;;  %v308_v44 = vadd.f32 %v1460_v62, %v1486_v40 }
 0x133   :  { %v255_v47 = vadd.f32 %v1460_v62, %v254_v45  ;;  %v348_v14 = vmax.f32 %v300_v41, 0.0  ;;  %v349_v43 = vmax.f32 %v303_v42, 0.0  ;;  %v311_v45 = vadd.f32 %v1460_v62, %v1491_v46 }
 0x134   :  { %v990_v48 = vpop.f32.mrf.mxu0  ;;  %v1018_v49 = vpop.f32.mrf.mxu1  ;;  %v364_v7 = vpack.c.bf16 %v347_v39, %v346_v1  ;;  %v350_v27 = vmax.f32 %v308_v44, 0.0 }
 0x135   :  { %v337_v51 = vmax.f32 %v255_v47, 0.0  ;;  %v365_v20 = vpack.c.bf16 %v349_v43, %v348_v14  ;;  %v1213_v47 = vld [vmem:[#allocation8] sm:$0xff]   ;;  %v351_v33 = vmax.f32 %v311_v45, 0.0 }
 0x136   :  { %v259_v52 = vpop.f32.mrf.mxu0  ;;  %v1494_v53 = vpop.f32.mrf.mxu1  ;;  %1110 = vmatpush3.bf16.msra.mxu0 %v1213_v47 }
 0x137   :  { %v359_v54 = vpack.c.bf16 %v337_v51, %v336_v50  ;;  %v260_v57 = vadd.f32 %v1460_v62, %v259_v52  ;;  %v366_v48 = vpack.c.bf16 %v351_v33, %v350_v27  ;;  %v316_v49 = vadd.f32 %v1460_v62, %v1494_v53 }
 0x138   :  { %v993_v55 = vpop.f32.mrf.mxu0  ;;  %v1021_v56 = vpop.f32.mrf.mxu1 }
 0x139   :  { %1056 = vmatmul.mubr.bf16.gmra.mxu1 %v359_v54  ;;  %v338_v2 = vmax.f32 %v260_v57, 0.0  ;;  %v352_v40 = vmax.f32 %v316_v49, 0.0  ;;  %v1550_v57 = vld [vmem:[%s1643_s4] ss:$0 sm:$0xff] }
 0x13a   :  { %v262_v58 = vpop.f32.mrf.mxu0  ;;  %1059 = vmatprep.mubr.msk.bf16.mxu1 %vm1331_vm0, %v1330_v0  ;;  %v1499_v59 = vpop.f32.mrf.mxu1 }
 0x13b   :  { %v263_v60 = vadd.f32 %v1460_v62, %v262_v58  ;;  %v319_v50 = vadd.f32 %v1460_v62, %v1499_v59 }
 0x13c   :  { %v994_v61 = vpop.f32.mrf.mxu0  ;;  %v1022_v63 = vpop.f32.mrf.mxu1 }
 0x13d   :  { %v339_v3 = vmax.f32 %v263_v60, 0.0  ;;  %v353_v46 = vmax.f32 %v319_v50, 0.0 }
 0x13e   :  { %v267_v4 = vpop.f32.mrf.mxu0  ;;  %v1502_v5 = vpop.f32.mrf.mxu1 }
 0x13f   :  { %v360_v6 = vpack.c.bf16 %v339_v3, %v338_v2  ;;  %v268_v10 = vadd.f32 %v1460_v62, %v267_v4  ;;  %v367_v51 = vpack.c.bf16 %v353_v46, %v352_v40  ;;  %v324_v52 = vadd.f32 %v1460_v62, %v1502_v5 }
 0x140   :  { %v997_v8 = vpop.f32.mrf.mxu0  ;;  %v1025_v9 = vpop.f32.mrf.mxu1 }
 0x141   :  { %1060 = vmatmul.mubr.bf16.gmra.mxu1 %v360_v6  ;;  %v340_v17 = vmax.f32 %v268_v10, 0.0  ;;  %v354_v53 = vmax.f32 %v324_v52, 0.0 }
 0x142   :  { %v270_v11 = vpop.f32.mrf.mxu0  ;;  %1063 = vmatprep.mubr.msk.bf16.mxu1 %vm1331_vm0, %v1330_v0  ;;  %v326_v12 = vpop.f32.mrf.mxu1 }
 0x143   :  { %v271_v13 = vadd.f32 %v1460_v62, %v270_v11  ;;  %v327_v54 = vadd.f32 %v1460_v62, %v326_v12 }
 0x144   :  { %v998_v15 = vpop.f32.mrf.mxu0  ;;  %v1026_v16 = vpop.f32.mrf.mxu1 }
 0x145   :  { %v341_v18 = vmax.f32 %v271_v13, 0.0  ;;  %v355_v55 = vmax.f32 %v327_v54, 0.0 }
 0x146   :  { %v275_v19 = vpop.f32.mrf.mxu0 }
 0x147   :  { %v361_v21 = vpack.c.bf16 %v341_v18, %v340_v17  ;;  %v276_v23 = vadd.f32 %v1460_v62, %v275_v19  ;;  %v368_v56 = vpack.c.bf16 %v355_v55, %v354_v53 }
 0x148   :  { %v1001_v22 = vpop.f32.mrf.mxu0 }
 0x149   :  { %1064 = vmatmul.mubr.bf16.gmra.mxu1 %v361_v21  ;;  %v342_v28 = vmax.f32 %v276_v23, 0.0 }
 0x14a   :  { %v278_v24 = vpop.f32.mrf.mxu0  ;;  %1067 = vmatprep.mubr.msk.bf16.mxu1 %vm1331_vm0, %v1330_v0 }
 0x14b   :  { %v279_v25 = vadd.f32 %v1460_v62, %v278_v24 }
 0x14c   :  { %v1002_v26 = vpop.f32.mrf.mxu0 }
 0x14d   :  { %v343_v29 = vmax.f32 %v279_v25, 0.0 }
 0x14f   :  { %v362_v31 = vpack.c.bf16 %v343_v29, %v342_v28 }
 0x151   :  { %1068 = vmatmul.mubr.bf16.gmra.mxu1 %v362_v31 }
 0x152   :  { %1071 = vmatprep.mubr.msk.bf16.mxu1 %vm1331_vm0, %v1330_v0 }
 0x159   :  { %1072 = vmatmul.mubr.bf16.gmra.mxu1 %v363_v36 }
 0x15a   :  { %1075 = vmatprep.mubr.msk.bf16.mxu1 %vm1331_vm0, %v1330_v0 }
 0x161   :  { %1076 = vmatmul.mubr.bf16.gmra.mxu1 %v364_v7 }
 0x162   :  { %1079 = vmatprep.mubr.msk.bf16.mxu1 %vm1331_vm0, %v1330_v0 }
 0x169   :  { %1080 = vmatmul.mubr.bf16.gmra.mxu1 %v365_v20 }
 0x16a   :  { %1083 = vmatprep.mubr.msk.bf16.mxu1 %vm1331_vm0, %v1330_v0 }
 0x171   :  { %1084 = vmatmul.mubr.bf16.gmra.mxu1 %v366_v48 }
 0x172   :  { %1087 = vmatprep.mubr.msk.bf16.mxu1 %vm1331_vm0, %v1330_v0 }
 0x179   :  { %1088 = vmatmul.mubr.bf16.gmra.mxu1 %v367_v51 }
 0x17a   :  { %1091 = vmatprep.mubr.msk.bf16.mxu1 %vm1331_vm0, %v1330_v0 }
 0x181   :  { %1092 = vmatmul.mubr.bf16.gmra.mxu1 %v368_v56 }
 0x1e1   :  { %v474_v58 = vpop.f32.mrf.mxu1 }
 0x1e2   :  { %v475_v60 = vadd.f32 %v1550_v57, %v474_v58 }
 0x1e3   :  { %v1045_v59 = vpop.f32.mrf.mxu1 }
 0x1e4   :  { %v577_v2 = vmax.f32 %v475_v60, 0.0 }
 0x1e5   :  { %v477_v61 = vpop.f32.mrf.mxu1 }
 0x1e6   :  { %v478_v62 = vadd.f32 %v1550_v57, %v477_v61 }
 0x1e7   :  { %v1046_v63 = vpop.f32.mrf.mxu1 }
 0x1e8   :  { %v578_v3 = vmax.f32 %v478_v62, 0.0 }
 0x1e9   :  { %v482_v4 = vpop.f32.mrf.mxu1 }
 0x1ea   :  { %v603_v5 = vpack.c.bf16 %v578_v3, %v577_v2  ;;  %v483_v8 = vadd.f32 %v1550_v57, %v482_v4 }
 0x1eb   :  { %v1049_v6 = vpop.f32.mrf.mxu1 }
 0x1ec   :  { %1112 = vmatmul.mubr.bf16.vlgmr.msra.gmra.mxu0 %v603_v5  ;;  %v579_v12 = vmax.f32 %v483_v8, 0.0 }
 0x1ed   :  { %v485_v9 = vpop.f32.mrf.mxu1  ;;  %1115 = vmatprep.mubr.msk.bf16.mxu0 %vm1331_vm0, %v1330_v0 }
 0x1ee   :  { %v486_v10 = vadd.f32 %v1550_v57, %v485_v9 }
 0x1ef   :  { %v1050_v11 = vpop.f32.mrf.mxu1 }
 0x1f0   :  { %v580_v13 = vmax.f32 %v486_v10, 0.0 }
 0x1f1   :  { %v490_v15 = vpop.f32.mrf.mxu1 }
 0x1f2   :  { %v604_v16 = vpack.c.bf16 %v580_v13, %v579_v12  ;;  %v491_v18 = vadd.f32 %v1550_v57, %v490_v15 }
 0x1f3   :  { %v1053_v17 = vpop.f32.mrf.mxu1 }
 0x1f4   :  { %1116 = vmatmul.mubr.bf16.gmra.mxu0 %v604_v16  ;;  %v581_v23 = vmax.f32 %v491_v18, 0.0 }
 0x1f5   :  { %v493_v19 = vpop.f32.mrf.mxu1  ;;  %1119 = vmatprep.mubr.msk.bf16.mxu0 %vm1331_vm0, %v1330_v0 }
 0x1f6   :  { %v494_v21 = vadd.f32 %v1550_v57, %v493_v19 }
 0x1f7   :  { %v1054_v22 = vpop.f32.mrf.mxu1 }
 0x1f8   :  { %v582_v24 = vmax.f32 %v494_v21, 0.0 }
 0x1f9   :  { %v498_v25 = vpop.f32.mrf.mxu1 }
 0x1fa   :  { %v605_v26 = vpack.c.bf16 %v582_v24, %v581_v23  ;;  %v499_v29 = vadd.f32 %v1550_v57, %v498_v25 }
 0x1fb   :  { %v1057_v28 = vpop.f32.mrf.mxu1 }
 0x1fc   :  { %1120 = vmatmul.mubr.bf16.gmra.mxu0 %v605_v26  ;;  %v583_v34 = vmax.f32 %v499_v29, 0.0 }
 0x1fd   :  { %v501_v30 = vpop.f32.mrf.mxu1  ;;  %1123 = vmatprep.mubr.msk.bf16.mxu0 %vm1331_vm0, %v1330_v0 }
 0x1fe   :  { %v502_v31 = vadd.f32 %v1550_v57, %v501_v30 }
 0x1ff   :  { %v1058_v32 = vpop.f32.mrf.mxu1 }
 0x200   :  { %v584_v35 = vmax.f32 %v502_v31, 0.0 }
 0x201   :  { %v506_v36 = vpop.f32.mrf.mxu1 }
 0x202   :  { %v606_v37 = vpack.c.bf16 %v584_v35, %v583_v34  ;;  %v507_v1 = vadd.f32 %v1550_v57, %v506_v36 }
 0x203   :  { %v1061_v38 = vpop.f32.mrf.mxu1 }
 0x204   :  { %1124 = vmatmul.mubr.bf16.gmra.mxu0 %v606_v37  ;;  %v585_v42 = vmax.f32 %v507_v1, 0.0 }
 0x205   :  { %v509_v39 = vpop.f32.mrf.mxu1  ;;  %1127 = vmatprep.mubr.msk.bf16.mxu0 %vm1331_vm0, %v1330_v0 }
 0x206   :  { %v510_v7 = vadd.f32 %v1550_v57, %v509_v39 }
 0x207   :  { %v1062_v41 = vpop.f32.mrf.mxu1 }
 0x208   :  { %v586_v14 = vmax.f32 %v510_v7, 0.0 }
 0x209   :  { %v514_v43 = vpop.f32.mrf.mxu1 }
 0x20a   :  { %v607_v20 = vpack.c.bf16 %v586_v14, %v585_v42  ;;  %v515_v45 = vadd.f32 %v1550_v57, %v514_v43 }
 0x20b   :  { %v1065_v44 = vpop.f32.mrf.mxu1 }
 0x20c   :  { %1128 = vmatmul.mubr.bf16.gmra.mxu0 %v607_v20  ;;  %v587_v48 = vmax.f32 %v515_v45, 0.0 }
 0x20d   :  { %v517_v47 = vpop.f32.mrf.mxu1  ;;  %1131 = vmatprep.mubr.msk.bf16.mxu0 %vm1331_vm0, %v1330_v0 }
 0x20e   :  { %v518_v27 = vadd.f32 %v1550_v57, %v517_v47 }
 0x20f   :  { %v1066_v33 = vpop.f32.mrf.mxu1 }
 0x210   :  { %v588_v49 = vmax.f32 %v518_v27, 0.0 }
 0x211   :  { %v522_v50 = vpop.f32.mrf.mxu1 }
 0x212   :  { %v608_v40 = vpack.c.bf16 %v588_v49, %v587_v48  ;;  %v523_v51 = vadd.f32 %v1550_v57, %v522_v50 }
 0x213   :  { %v1069_v46 = vpop.f32.mrf.mxu1 }
 0x214   :  { %1132 = vmatmul.mubr.bf16.gmra.mxu0 %v608_v40  ;;  %v589_v55 = vmax.f32 %v523_v51, 0.0  ;;  %v1605_v46 = vld [vmem:[%s1645_s6] ss:$0 sm:$0xff]  ;;  %s1332_s6 = smov [#allocation10]  }
 0x215   :  { %v525_v52 = vpop.f32.mrf.mxu1  ;;  %1135 = vmatprep.mubr.msk.bf16.mxu0 %vm1331_vm0, %v1330_v0  ;;  %s855_s25 = sshll.u32 %s1332_s6, 4  ;;  %s856_s25 = int_to_ptr.vmem [resolvable:$true] %s855_s25 }
 0x216   :  { %v526_v54 = vadd.f32 %v1550_v57, %v525_v52  ;;  %s1294_s26 = scalar_lea.vmem %s856_s25, 3328  ;;  %p1299_p7 = scmp.lt.s32.totalorder %s856_s25, %s856_s25 }
 0x217   :  { %v1070_v53 = vpop.f32.mrf.mxu1  ;;  %p1295_p6 = scmp.ne.s32.totalorder %s856_s25, %s1294_s26  ;;  %p1300_p8 = scmp.lt.s32.totalorder %s1294_s26, %s1294_s26 }
 0x218   :  { %v590_v56 = vmax.f32 %v526_v54, 0.0 }
 0x219   :  { %v530_v58 = vpop.f32.mrf.mxu1  ;;  %p1301_p9 = por %p1300_p8, %p1299_p7 }
 0x21a   :  { %v609_v59 = vpack.c.bf16 %v590_v56, %v589_v55  ;;  %v531_v61 = vadd.f32 %v1550_v57, %v530_v58 }
 0x21b   :  { %v1073_v60 = vpop.f32.mrf.mxu1  ;;  %p1302_p10 = pnand %p1301_p9, %p1295_p6 }
 0x21c   :  { %1136 = vmatmul.mubr.bf16.gmra.mxu0 %v609_v59  ;;  %v591_v3 = vmax.f32 %v531_v61, 0.0 }
 0x21d   :  { %v533_v62 = vpop.f32.mrf.mxu1  ;;  %1139 = vmatprep.mubr.msk.bf16.mxu0 %vm1331_vm0, %v1330_v0 }
 0x21e   :  { %v534_v63 = vadd.f32 %v1550_v57, %v533_v62 }
 0x21f   :  { %v1074_v2 = vpop.f32.mrf.mxu1 }
 0x220   :  { %v592_v4 = vmax.f32 %v534_v63, 0.0 }
 0x221   :  { %v538_v5 = vpop.f32.mrf.mxu1 }
 0x222   :  { %v610_v6 = vpack.c.bf16 %v592_v4, %v591_v3  ;;  %v539_v9 = vadd.f32 %v1550_v57, %v538_v5 }
 0x223   :  { %v1077_v8 = vpop.f32.mrf.mxu1 }
 0x224   :  { %1140 = vmatmul.mubr.bf16.gmra.mxu0 %v610_v6  ;;  %v593_v13 = vmax.f32 %v539_v9, 0.0 }
 0x225   :  { %v541_v10 = vpop.f32.mrf.mxu1  ;;  %1143 = vmatprep.mubr.msk.bf16.mxu0 %vm1331_vm0, %v1330_v0 }
 0x226   :  { %v542_v11 = vadd.f32 %v1550_v57, %v541_v10 }
 0x227   :  { %v1078_v12 = vpop.f32.mrf.mxu1 }
 0x228   :  { %v594_v15 = vmax.f32 %v542_v11, 0.0 }
 0x229   :  { %v546_v16 = vpop.f32.mrf.mxu1 }
 0x22a   :  { %v611_v17 = vpack.c.bf16 %v594_v15, %v593_v13  ;;  %v547_v19 = vadd.f32 %v1550_v57, %v546_v16 }
 0x22b   :  { %v1081_v18 = vpop.f32.mrf.mxu1 }
 0x22c   :  { %1144 = vmatmul.mubr.bf16.gmra.mxu0 %v611_v17  ;;  %v595_v24 = vmax.f32 %v547_v19, 0.0 }
 0x22d   :  { %v549_v21 = vpop.f32.mrf.mxu1  ;;  %1147 = vmatprep.mubr.msk.bf16.mxu0 %vm1331_vm0, %v1330_v0 }
 0x22e   :  { %v550_v22 = vadd.f32 %v1550_v57, %v549_v21 }
 0x22f   :  { %v1082_v23 = vpop.f32.mrf.mxu1 }
 0x230   :  { %v596_v25 = vmax.f32 %v550_v22, 0.0 }
 0x231   :  { %v554_v26 = vpop.f32.mrf.mxu1 }
 0x232   :  { %v612_v28 = vpack.c.bf16 %v596_v25, %v595_v24  ;;  %v555_v30 = vadd.f32 %v1550_v57, %v554_v26 }
 0x233   :  { %v1085_v29 = vpop.f32.mrf.mxu1 }
 0x234   :  { %1148 = vmatmul.mubr.bf16.gmra.mxu0 %v612_v28  ;;  %v597_v35 = vmax.f32 %v555_v30, 0.0 }
 0x235   :  { %v557_v31 = vpop.f32.mrf.mxu1  ;;  %1151 = vmatprep.mubr.msk.bf16.mxu0 %vm1331_vm0, %v1330_v0 }
 0x236   :  { %v558_v32 = vadd.f32 %v1550_v57, %v557_v31 }
 0x237   :  { %v1086_v34 = vpop.f32.mrf.mxu1 }
 0x238   :  { %v598_v36 = vmax.f32 %v558_v32, 0.0 }
 0x239   :  { %v562_v37 = vpop.f32.mrf.mxu1 }
 0x23a   :  { %v613_v38 = vpack.c.bf16 %v598_v36, %v597_v35  ;;  %v563_v39 = vadd.f32 %v1550_v57, %v562_v37 }
 0x23b   :  { %v1089_v1 = vpop.f32.mrf.mxu1 }
 0x23c   :  { %1152 = vmatmul.mubr.bf16.gmra.mxu0 %v613_v38  ;;  %v599_v14 = vmax.f32 %v563_v39, 0.0 }
 0x23d   :  { %v565_v7 = vpop.f32.mrf.mxu1  ;;  %1155 = vmatprep.mubr.msk.bf16.mxu0 %vm1331_vm0, %v1330_v0 }
 0x23e   :  { %v566_v41 = vadd.f32 %v1550_v57, %v565_v7 }
 0x23f   :  { %v1090_v42 = vpop.f32.mrf.mxu1 }
 0x240   :  { %v600_v43 = vmax.f32 %v566_v41, 0.0 }
 0x241   :  { %v570_v20 = vpop.f32.mrf.mxu1 }
 0x242   :  { %v614_v44 = vpack.c.bf16 %v600_v43, %v599_v14  ;;  %v571_v47 = vadd.f32 %v1550_v57, %v570_v20 }
 0x243   :  { %v1093_v45 = vpop.f32.mrf.mxu1 }
 0x244   :  { %1156 = vmatmul.mubr.bf16.gmra.mxu0 %v614_v44  ;;  %v601_v49 = vmax.f32 %v571_v47, 0.0 }
 0x245   :  { %v573_v27 = vpop.f32.mrf.mxu1  ;;  %1159 = vmatprep.mubr.msk.bf16.mxu0 %vm1331_vm0, %v1330_v0 }
 0x246   :  { %v574_v33 = vadd.f32 %v1550_v57, %v573_v27 }
 0x247   :  { %v1094_v48 = vpop.f32.mrf.mxu1 }
 0x248   :  { %v602_v50 = vmax.f32 %v574_v33, 0.0 }
 0x24a   :  { %v615_v40 = vpack.c.bf16 %v602_v50, %v601_v49 }
 0x24c   :  { %1160 = vmatmul.mubr.bf16.gmra.mxu0 %v615_v40 }
 0x2ac   :  { %v721_v51 = vpop.f32.mrf.mxu0 }
 0x2ad   :  { %v722_v52 = vadd.f32 %v1605_v46, %v721_v51 }
 0x2ae   :  { %v1113_v54 = vpop.f32.mrf.mxu0 }
 0x2af   :  { %824 = vst [vmem:[#allocation10] sm:$0xff] %v722_v52 }
 0x2b0   :  { %v724_v53 = vpop.f32.mrf.mxu0 }
 0x2b1   :  { %v725_v0 = vadd.f32 %v1605_v46, %v724_v53 }
 0x2b2   :  { %v1114_v55 = vpop.f32.mrf.mxu0 }
 0x2b3   :  { %825 = vst [vmem:[#allocation10 + $0x8] sm:$0xff] %v725_v0 }
 0x2b4   :  { %v729_v57 = vpop.f32.mrf.mxu0 }
 0x2b5   :  { %v730_v56 = vadd.f32 %v1605_v46, %v729_v57 }
 0x2b6   :  { %v1117_v58 = vpop.f32.mrf.mxu0 }
 0x2b7   :  { %826 = vst [vmem:[#allocation10 + $0x10] sm:$0xff] %v730_v56 }
 0x2b8   :  { %v732_v59 = vpop.f32.mrf.mxu0 }
 0x2b9   :  { %v733_v60 = vadd.f32 %v1605_v46, %v732_v59 }
 0x2ba   :  { %v1118_v61 = vpop.f32.mrf.mxu0 }
 0x2bb   :  { %827 = vst [vmem:[#allocation10 + $0x18] sm:$0xff] %v733_v60 }
 0x2bc   :  { %v737_v62 = vpop.f32.mrf.mxu0 }
 0x2bd   :  { %v738_v63 = vadd.f32 %v1605_v46, %v737_v62 }
 0x2be   :  { %v1121_v2 = vpop.f32.mrf.mxu0 }
 0x2bf   :  { %828 = vst [vmem:[#allocation10 + $0x20] sm:$0xff] %v738_v63 }
 0x2c0   :  { %v740_v3 = vpop.f32.mrf.mxu0 }
 0x2c1   :  { %v741_v4 = vadd.f32 %v1605_v46, %v740_v3 }
 0x2c2   :  { %v1122_v5 = vpop.f32.mrf.mxu0 }
 0x2c3   :  { %829 = vst [vmem:[#allocation10 + $0x28] sm:$0xff] %v741_v4 }
 0x2c4   :  { %v745_v6 = vpop.f32.mrf.mxu0 }
 0x2c5   :  { %v746_v8 = vadd.f32 %v1605_v46, %v745_v6 }
 0x2c6   :  { %v1125_v9 = vpop.f32.mrf.mxu0 }
 0x2c7   :  { %830 = vst [vmem:[#allocation10 + $0x30] sm:$0xff] %v746_v8 }
 0x2c8   :  { %v748_v10 = vpop.f32.mrf.mxu0 }
 0x2c9   :  { %v749_v11 = vadd.f32 %v1605_v46, %v748_v10 }
 0x2ca   :  { %v1126_v12 = vpop.f32.mrf.mxu0 }
 0x2cb   :  { %831 = vst [vmem:[#allocation10 + $0x38] sm:$0xff] %v749_v11 }
 0x2cc   :  { %v753_v13 = vpop.f32.mrf.mxu0 }
 0x2cd   :  { %v754_v15 = vadd.f32 %v1605_v46, %v753_v13 }
 0x2ce   :  { %v1129_v16 = vpop.f32.mrf.mxu0 }
 0x2cf   :  { %832 = vst [vmem:[#allocation10 + $0x40] sm:$0xff] %v754_v15 }
 0x2d0   :  { %v756_v17 = vpop.f32.mrf.mxu0 }
 0x2d1   :  { %v757_v18 = vadd.f32 %v1605_v46, %v756_v17 }
 0x2d2   :  { %v1130_v19 = vpop.f32.mrf.mxu0 }
 0x2d3   :  { %833 = vst [vmem:[#allocation10 + $0x48] sm:$0xff] %v757_v18 }
 0x2d4   :  { %v761_v21 = vpop.f32.mrf.mxu0 }
 0x2d5   :  { %v762_v22 = vadd.f32 %v1605_v46, %v761_v21 }
 0x2d6   :  { %v1133_v23 = vpop.f32.mrf.mxu0 }
 0x2d7   :  { %834 = vst [vmem:[#allocation10 + $0x50] sm:$0xff] %v762_v22 }
 0x2d8   :  { %v764_v24 = vpop.f32.mrf.mxu0 }
 0x2d9   :  { %v765_v25 = vadd.f32 %v1605_v46, %v764_v24 }
 0x2da   :  { %v1134_v26 = vpop.f32.mrf.mxu0 }
 0x2db   :  { %835 = vst [vmem:[#allocation10 + $0x58] sm:$0xff] %v765_v25 }
 0x2dc   :  { %v769_v28 = vpop.f32.mrf.mxu0 }
 0x2dd   :  { %v770_v29 = vadd.f32 %v1605_v46, %v769_v28 }
 0x2de   :  { %v1137_v30 = vpop.f32.mrf.mxu0 }
 0x2df   :  { %836 = vst [vmem:[#allocation10 + $0x60] sm:$0xff] %v770_v29 }
 0x2e0   :  { %v772_v31 = vpop.f32.mrf.mxu0 }
 0x2e1   :  { %v773_v32 = vadd.f32 %v1605_v46, %v772_v31 }
 0x2e2   :  { %v1138_v34 = vpop.f32.mrf.mxu0 }
 0x2e3   :  { %837 = vst [vmem:[#allocation10 + $0x68] sm:$0xff] %v773_v32 }
 0x2e4   :  { %v777_v35 = vpop.f32.mrf.mxu0 }
 0x2e5   :  { %v778_v36 = vadd.f32 %v1605_v46, %v777_v35 }
 0x2e6   :  { %v1141_v37 = vpop.f32.mrf.mxu0 }
 0x2e7   :  { %838 = vst [vmem:[#allocation10 + $0x70] sm:$0xff] %v778_v36 }
 0x2e8   :  { %v780_v38 = vpop.f32.mrf.mxu0 }
 0x2e9   :  { %v781_v1 = vadd.f32 %v1605_v46, %v780_v38 }
 0x2ea   :  { %v1142_v39 = vpop.f32.mrf.mxu0 }
 0x2eb   :  { %839 = vst [vmem:[#allocation10 + $0x78] sm:$0xff] %v781_v1 }
 0x2ec   :  { %v785_v7 = vpop.f32.mrf.mxu0 }
 0x2ed   :  { %v786_v41 = vadd.f32 %v1605_v46, %v785_v7 }
 0x2ee   :  { %v1145_v42 = vpop.f32.mrf.mxu0 }
 0x2ef   :  { %840 = vst [vmem:[#allocation10 + $0x80] sm:$0xff] %v786_v41 }
 0x2f0   :  { %v788_v14 = vpop.f32.mrf.mxu0 }
 0x2f1   :  { %v789_v43 = vadd.f32 %v1605_v46, %v788_v14 }
 0x2f2   :  { %v1146_v20 = vpop.f32.mrf.mxu0 }
 0x2f3   :  { %841 = vst [vmem:[#allocation10 + $0x88] sm:$0xff] %v789_v43 }
 0x2f4   :  { %v793_v44 = vpop.f32.mrf.mxu0 }
 0x2f5   :  { %v794_v45 = vadd.f32 %v1605_v46, %v793_v44 }
 0x2f6   :  { %v1149_v47 = vpop.f32.mrf.mxu0 }
 0x2f7   :  { %842 = vst [vmem:[#allocation10 + $0x90] sm:$0xff] %v794_v45 }
 0x2f8   :  { %v796_v27 = vpop.f32.mrf.mxu0 }
 0x2f9   :  { %v797_v33 = vadd.f32 %v1605_v46, %v796_v27 }
 0x2fa   :  { %v1150_v48 = vpop.f32.mrf.mxu0 }
 0x2fb   :  { %843 = vst [vmem:[#allocation10 + $0x98] sm:$0xff] %v797_v33 }
 0x2fc   :  { %v801_v49 = vpop.f32.mrf.mxu0 }
 0x2fd   :  { %v802_v50 = vadd.f32 %v1605_v46, %v801_v49 }
 0x2fe   :  { %v1153_v40 = vpop.f32.mrf.mxu0 }
 0x2ff   :  { %844 = vst [vmem:[#allocation10 + $0xa0] sm:$0xff] %v802_v50 }
 0x300   :  { %v804_v51 = vpop.f32.mrf.mxu0 }
 0x301   :  { %v805_v52 = vadd.f32 %v1605_v46, %v804_v51 }
 0x302   :  { %v1154_v54 = vpop.f32.mrf.mxu0 }
 0x303   :  { %845 = vst [vmem:[#allocation10 + $0xa8] sm:$0xff] %v805_v52 }
 0x304   :  { %v809_v53 = vpop.f32.mrf.mxu0 }
 0x305   :  { %v810_v0 = vadd.f32 %v1605_v46, %v809_v53 }
 0x306   :  { %v1157_v55 = vpop.f32.mrf.mxu0 }
 0x307   :  { %846 = vst [vmem:[#allocation10 + $0xb0] sm:$0xff] %v810_v0 }
 0x308   :  { %v812_v57 = vpop.f32.mrf.mxu0 }
 0x309   :  { %v813_v56 = vadd.f32 %v1605_v46, %v812_v57 }
 0x30a   :  { %v1158_v58 = vpop.f32.mrf.mxu0 }
 0x30b   :  { %847 = vst [vmem:[#allocation10 + $0xb8] sm:$0xff] %v813_v56 }
 0x30c   :  { %v817_v59 = vpop.f32.mrf.mxu0 }
 0x30d   :  { %v818_v60 = vadd.f32 %v1605_v46, %v817_v59 }
 0x30e   :  { %v1161_v61 = vpop.f32.mrf.mxu0 }
 0x30f   :  { %848 = vst [vmem:[#allocation10 + $0xc0] sm:$0xff] %v818_v60 }
 0x310   :  { %v820_v62 = vpop.f32.mrf.mxu0 }
 0x311   :  { %v821_v63 = vadd.f32 %v1605_v46, %v820_v62 }
 0x312   :  { %v1162_v2 = vpop.f32.mrf.mxu0 }
 0x313   :  { %849 = vst [vmem:[#allocation10 + $0xc8] sm:$0xff] %v821_v63 }
 0x314   :  { %1305 = shalt.err (!%p1302_p10)
}
 0x315   :  { %861 = dma.vmem_to_hbm [thread:$0]  %s856_s25, 3328, %s1646_s7, [#allocation4], %s1326_s11, %s1326_s11, %s1327_s12  }
 0x316   :  { %1320 = dma.done.wait [#allocation4], 3328  }
 0x317   :  { %1321 = vsyncadd [#allocation4], 4294963968 }
 0x318   :  { %865 = vsyncpa [#allocation3], 1 }
 0x319   :  { %866 = vsyncpa [#allocation6], 1 }
 0x31a   :  { %867 = vsyncpa [#allocation9], 1 }
 0x31b   :  { %868 = vsyncpa [#allocation4], 1 }

</bundles_post_ra>
